<compile_context>
chip_gen: v6e
topology: v6e:2x2x1
jax: 0.10.0
libtpu: 0.0.40
codegen_flags: <defaults>
</compile_context>

<pallas_src>
import functools
import math

import jax
import jax.numpy as jnp
from jax.experimental import pallas as pl
from jax.experimental.pallas import tpu as pltpu

KERNEL_SIZE = 4
PADDING = 1  # int((4 - 1) / 2)
LEAKY_SLOPE = 0.2

# Tile targets: big enough to amortize the ~0.35 us per-grid-step overhead,
# small enough to double-buffer comfortably inside the default scoped VMEM
# limits on v5e/v6e/v7x (largest block here is ~1 MiB).
TM_TARGET = 512   # M (rows of the patch matrix) tile
TK_TARGET = 512   # K (reduction) tile


def _round_up(x, m):
    return (x + m - 1) // m * m


def _tile(dim, target, align):
    """Pick (tile, padded_dim) with tile | padded_dim and tile % align == 0."""
    padded = _round_up(dim, align)
    if padded <= target:
        return padded, padded
    return target, _round_up(dim, target)


# ----------------------------------------------------------------------------
# Pallas kernels: tiled conv-as-matmul, bias folded into accumulator init,
# optional fused LeakyReLU epilogue.  Accumulation is done in-place in the
# resident f32 output block (same output block index across the K axis).
# ----------------------------------------------------------------------------
def _conv_kernel(p_ref, w_ref, b_ref, o_ref):
    k = pl.program_id(1)

    @pl.when(k == 0)
    def _():
        o_ref[...] = jnp.broadcast_to(b_ref[...], o_ref.shape)

    o_ref[...] += jnp.dot(p_ref[...], w_ref[...],
                          preferred_element_type=jnp.float32)


def _conv_lrelu_kernel(p_ref, w_ref, b_ref, o_ref, a_ref):
    k = pl.program_id(1)

    @pl.when(k == 0)
    def _():
        o_ref[...] = jnp.broadcast_to(b_ref[...], o_ref.shape)

    o_ref[...] += jnp.dot(p_ref[...], w_ref[...],
                          preferred_element_type=jnp.float32)

    @pl.when(k == pl.num_programs(1) - 1)
    def _():
        pre = o_ref[...]
        a_ref[...] = jnp.where(pre >= 0.0, pre, pre * LEAKY_SLOPE)


# ----------------------------------------------------------------------------
# Glue (plain JAX): im2col patch extraction in NHWC (no transposes).
# ----------------------------------------------------------------------------
def _im2col_nhwc(x_nhwc, k, stride, pad):
    n, h, w, c = x_nhwc.shape
    xp = jnp.pad(x_nhwc, ((0, 0), (pad, pad), (pad, pad), (0, 0)))
    hp, wp = h + 2 * pad, w + 2 * pad
    ho = (hp - k) // stride + 1
    wo = (wp - k) // stride + 1
    cols = []
    for ky in range(k):
        for kx in range(k):
            sl = xp[:, ky:ky + stride * ho:stride, kx:kx + stride * wo:stride, :]
            cols.append(sl)                       # (N, Ho, Wo, C)
    patches = jnp.concatenate(cols, axis=-1)      # (N, Ho, Wo, k*k*C), (ky,kx,cin) order
    return patches.reshape(n * ho * wo, k * k * c), (n, ho, wo)


def conv2d_pallas(x_nhwc, weight, bias, stride, fuse_lrelu):
    """PyTorch-semantics Conv2d(k=4, pad=1, stride) [+ fused LeakyReLU(0.2)].

    x_nhwc: (N, H, W, Cin);  weight: (Cout, Cin, KH, KW);  bias: (Cout,).
    Returns (pre_activation, post_activation_or_None), NHWC f32.
    """
    cout, cin, kh, kw = weight.shape
    patches, (n, ho, wo) = _im2col_nhwc(x_nhwc, kh, stride, PADDING)
    m, kdim = patches.shape

    tm, mp = _tile(m, TM_TARGET, 8)       # sublane-aligned M tile
    tk, kp = _tile(kdim, TK_TARGET, 128)  # lane-aligned K tile
    cn = _round_up(cout, 128)             # lane-dense, unmasked output stores

    # Zero-pad + bf16 cast (MXU-native inputs, f32 accumulation).
    p = jnp.pad(patches, ((0, mp - m), (0, kp - kdim))).astype(jnp.bfloat16)
    wmat = jnp.transpose(weight, (2, 3, 1, 0)).reshape(kdim, cout)  # (ky,kx,cin) x cout
    w_p = jnp.pad(wmat, ((0, kp - kdim), (0, cn - cout))).astype(jnp.bfloat16)
    b_p = jnp.pad(bias.astype(jnp.float32)[None, :], ((0, 0), (0, cn - cout)))

    nm, nk = mp // tm, kp // tk

    out_spec = pl.BlockSpec((tm, cn), lambda i, k: (i, 0))
    if fuse_lrelu:
        kernel = _conv_lrelu_kernel
        out_shape = (jax.ShapeDtypeStruct((mp, cn), jnp.float32),
                     jax.ShapeDtypeStruct((mp, cn), jnp.float32))
        out_specs = [out_spec, out_spec]
        n_out = 2
    else:
        kernel = _conv_kernel
        out_shape = jax.ShapeDtypeStruct((mp, cn), jnp.float32)
        out_specs = out_spec
        n_out = 1

    cost = pl.CostEstimate(
        flops=2 * mp * kp * cn,
        transcendentals=0,
        bytes_accessed=mp * kp * 2 + kp * cn * 2 + n_out * mp * cn * 4,
    )

    results = pl.pallas_call(
        kernel,
        out_shape=out_shape,
        grid_spec=pltpu.PrefetchScalarGridSpec(
            num_scalar_prefetch=0,
            grid=(nm, nk),
            in_specs=[
                pl.BlockSpec((tm, tk), lambda i, k: (i, k)),
                pl.BlockSpec((tk, cn), lambda i, k: (k, 0)),
                pl.BlockSpec((1, cn), lambda i, k: (0, 0)),
            ],
            out_specs=out_specs,
        ),
        compiler_params=pltpu.CompilerParams(
            dimension_semantics=("parallel", "arbitrary"),
            vmem_limit_bytes=32 * 1024 * 1024,
        ),
        cost_estimate=cost,
    )(p, w_p, b_p)

    if fuse_lrelu:
        pre, post = results
        pre = pre[:m, :cout].reshape(n, ho, wo, cout)
        post = post[:m, :cout].reshape(n, ho, wo, cout)
        return pre, post
    pre = results[:m, :cout].reshape(n, ho, wo, cout)
    return pre, None


def _to_nhwc(x_nchw):
    return jnp.transpose(x_nchw, (0, 2, 3, 1))


def _to_nchw(x_nhwc):
    return jnp.transpose(x_nhwc, (0, 3, 1, 2))


# ----------------------------------------------------------------------------
# Parameter construction (deterministic, mirrors NLayerDiscriminator.__init__)
# ----------------------------------------------------------------------------
class Opt:
    def __init__(self, inputDim, channelsD, numLayerD, numD, noSpectralNormD=True):
        self.inputDim = inputDim
        self.channelsD = channelsD
        self.numLayerD = numLayerD
        self.numD = numD
        self.noSpectralNormD = noSpectralNormD


def _conv_params(key, cin, cout):
    kw, kb = jax.random.split(key)
    fan_in = cin * KERNEL_SIZE * KERNEL_SIZE
    w = jax.random.normal(kw, (cout, cin, KERNEL_SIZE, KERNEL_SIZE), jnp.float32)
    w = w * (1.0 / math.sqrt(fan_in))
    b = jax.random.normal(kb, (cout,), jnp.float32) * 0.01
    return w, b


def init_nlayer_params(key, opt):
    input_dim = opt.inputDim + 1
    channels = opt.channelsD
    keys = jax.random.split(key, opt.numLayerD + 1)
    layers = []
    w, b = _conv_params(keys[0], input_dim, channels)
    layers.append(dict(w=w, b=b, stride=2, act=True))
    for i in range(1, opt.numLayerD):
        channels_prev = channels
        channels = min(channels_prev * 2, 512)
        stride = 1 if i == opt.numLayerD - 1 else 2
        w, b = _conv_params(keys[i], channels_prev, channels)
        layers.append(dict(w=w, b=b, stride=stride, act=True))
    w, b = _conv_params(keys[opt.numLayerD], channels, 1)
    layers.append(dict(w=w, b=b, stride=1, act=False))
    return layers


def init_multiscale_params(key, opt):
    keys = jax.random.split(key, opt.numD)
    return [init_nlayer_params(keys[i], opt) for i in range(opt.numD)]


# ----------------------------------------------------------------------------
# Forward passes (NHWC internally; public interface NCHW like PyTorch)
# ----------------------------------------------------------------------------
def nlayer_forward(layers, fake_nhwc, real_nhwc):
    x = jnp.concatenate([fake_nhwc, real_nhwc], axis=0)  # cat along batch
    outputs = []
    for layer in layers:
        pre, post = conv2d_pallas(x, layer["w"], layer["b"], layer["stride"],
                                  fuse_lrelu=layer["act"])
        outputs.append(_to_nchw(pre))          # Conv2d output
        if layer["act"]:
            outputs.append(_to_nchw(post))     # LeakyReLU output
            x = post
        else:
            x = pre
    return outputs                             # == output[1:] in PyTorch


def multiscale_forward(all_params, fake_nchw, real_nchw):
    fake, real = _to_nhwc(fake_nchw), _to_nhwc(real_nchw)
    outputs = []
    for layers in all_params:
        outputs.append(nlayer_forward(layers, fake, real))
        # F.interpolate(scale_factor=0.5, mode='nearest') == every 2nd pixel.
        fake, real = fake[:, ::2, ::2, :], real[:, ::2, ::2, :]
    return outputs


# ----------------------------------------------------------------------------
# Pure-jnp reference (same math, same bf16 cast of matmul inputs, no Pallas)
# ----------------------------------------------------------------------------
def _conv2d_ref(x_nhwc, w, b, stride):
    cout = w.shape[0]
    patches, (n, ho, wo) = _im2col_nhwc(x_nhwc, KERNEL_SIZE, stride, PADDING)
    wmat = jnp.transpose(w, (2, 3, 1, 0)).reshape(-1, cout)
    pre = (patches.astype(jnp.bfloat16).astype(jnp.float32)
           @ wmat.astype(jnp.bfloat16).astype(jnp.float32)) + b[None, :]
    pre = pre.reshape(n, ho, wo, cout)
    post = jnp.where(pre >= 0.0, pre, pre * LEAKY_SLOPE)
    return pre, post


def _nlayer_forward_ref(layers, fake_nhwc, real_nhwc):
    x = jnp.concatenate([fake_nhwc, real_nhwc], axis=0)
    outputs = []
    for layer in layers:
        pre, post = _conv2d_ref(x, layer["w"], layer["b"], layer["stride"])
        outputs.append(_to_nchw(pre))
        if layer["act"]:
            outputs.append(_to_nchw(post))
            x = post
        else:
            x = pre
    return outputs


def _multiscale_forward_ref(all_params, fake_nchw, real_nchw):
    fake, real = _to_nhwc(fake_nchw), _to_nhwc(real_nchw)
    outputs = []
    for layers in all_params:
        outputs.append(_nlayer_forward_ref(layers, fake, real))
        fake, real = fake[:, ::2, ::2, :], real[:, ::2, ::2, :]
    return outputs


# ----------------------------------------------------------------------------
if __name__ == "__main__":
    opt = Opt(inputDim=3, channelsD=8, numLayerD=2, numD=2, noSpectralNormD=True)

    key = jax.random.PRNGKey(0)
    k_params, k_fake, k_real = jax.random.split(key, 3)

    params = init_multiscale_params(k_params, opt)

    # Images have opt.inputDim + 1 = 4 channels (label channel already concatenated).
    fake = jax.random.normal(k_fake, (2, opt.inputDim + 1, 16, 16), jnp.float32)
    real = jax.random.normal(k_real, (2, opt.inputDim + 1, 16, 16), jnp.float32)

    fwd = jax.jit(functools.partial(multiscale_forward, params))
    outs = jax.block_until_ready(fwd(fake, real))

    # sanity check against the pure-jnp reference path
    refs = _multiscale_forward_ref(params, fake, real)
    for d_out, d_ref in zip(outs, refs):
        assert len(d_out) == len(d_ref)
        for o, r in zip(d_out, d_ref):
            assert o.shape == r.shape, (o.shape, r.shape)
            err = float(jnp.max(jnp.abs(o - r)))
            assert err < 2e-2, f"mismatch {err}"

    print("KERNEL_OK")
</pallas_src>

<mosaic_0001>
module attributes {stable_mosaic.version = 11 : i64} {
  func.func @_conv_lrelu_kernel(%arg0: i32, %arg1: i32, %arg2: memref<256x128xbf16, #tpu.memory_space<vmem>>, %arg3: memref<128x128xbf16, #tpu.memory_space<vmem>>, %arg4: memref<1x128xf32, #tpu.memory_space<vmem>>, %arg5: memref<256x128xf32, #tpu.memory_space<vmem>>, %arg6: memref<256x128xf32, #tpu.memory_space<vmem>>) attributes {dimension_semantics = [#tpu.dimension_semantics<parallel>, #tpu.dimension_semantics<arbitrary>], iteration_bounds = array<i64: 1, 1>, scalar_prefetch = 0 : i64, scratch_operands = 0 : i64, tpu.core_type = #tpu.core_type<tc>, window_params = [{transform_indices = @transform_0, window_bounds = array<i64: 256, 128>}, {transform_indices = @transform_1, window_bounds = array<i64: 128, 128>}, {pipeline_mode = #tpu.pipeline_mode<synchronous>, transform_indices = @transform_2, window_bounds = array<i64: 1, 128>}, {transform_indices = @transform_3, window_bounds = array<i64: 256, 128>}, {transform_indices = @transform_4, window_bounds = array<i64: 256, 128>}]} {
    %c0_i32 = arith.constant 0 : i32
    %0 = arith.cmpi eq, %arg1, %c0_i32 : i32
    %1 = arith.extui %0 : i1 to i32
    %c0_i32_0 = arith.constant 0 : i32
    %2 = arith.cmpi ne, %1, %c0_i32_0 : i32
    scf.if %2 {
      %c0_10 = arith.constant 0 : index
      %c0_11 = arith.constant 0 : index
      %12 = vector.load %arg4[%c0_10, %c0_11] : memref<1x128xf32, #tpu.memory_space<vmem>>, vector<1x128xf32>
      %13 = vector.shape_cast %12 : vector<1x128xf32> to vector<1x128xf32>
      %14 = vector.broadcast %13 : vector<1x128xf32> to vector<256x128xf32>
      %c0_12 = arith.constant 0 : index
      %c0_13 = arith.constant 0 : index
      %15 = vector.load %arg5[%c0_12, %c0_13] : memref<256x128xf32, #tpu.memory_space<vmem>>, vector<256x128xf32>
      tpu.vector_store %arg5[%c0_12, %c0_13], %14 {strides = array<i32>} : memref<256x128xf32, #tpu.memory_space<vmem>>, vector<256x128xf32>,
    } else {
    }
    %c0 = arith.constant 0 : index
    %c0_1 = arith.constant 0 : index
    %3 = vector.load %arg5[%c0, %c0_1] : memref<256x128xf32, #tpu.memory_space<vmem>>, vector<256x128xf32>
    %c0_2 = arith.constant 0 : index
    %c0_3 = arith.constant 0 : index
    %4 = vector.load %arg2[%c0_2, %c0_3] : memref<256x128xbf16, #tpu.memory_space<vmem>>, vector<256x128xbf16>
    %c0_4 = arith.constant 0 : index
    %c0_5 = arith.constant 0 : index
    %5 = vector.load %arg3[%c0_4, %c0_5] : memref<128x128xbf16, #tpu.memory_space<vmem>>, vector<128x128xbf16>
    %cst = arith.constant dense<0.000000e+00> : vector<256x128xf32>
    %6 = tpu.matmul %4, %5, %cst {dimension_numbers = #tpu.dot_dimension_numbers<[1], [0], [0], [1], [0, 0, 1, 1], [], []>} : vector<256x128xbf16>, vector<128x128xbf16>, vector<256x128xf32> -> vector<256x128xf32>
    %7 = arith.addf %3, %6 : vector<256x128xf32>
    %c0_6 = arith.constant 0 : index
    %c0_7 = arith.constant 0 : index
    %8 = vector.load %arg5[%c0_6, %c0_7] : memref<256x128xf32, #tpu.memory_space<vmem>>, vector<256x128xf32>
    tpu.vector_store %arg5[%c0_6, %c0_7], %7 {strides = array<i32>} : memref<256x128xf32, #tpu.memory_space<vmem>>, vector<256x128xf32>,
    %c0_i32_8 = arith.constant 0 : i32
    %9 = arith.cmpi eq, %arg1, %c0_i32_8 : i32
    %10 = arith.extui %9 : i1 to i32
    %c0_i32_9 = arith.constant 0 : i32
    %11 = arith.cmpi ne, %10, %c0_i32_9 : i32
    scf.if %11 {
      %c0_10 = arith.constant 0 : index
      %c0_11 = arith.constant 0 : index
      %12 = vector.load %arg5[%c0_10, %c0_11] : memref<256x128xf32, #tpu.memory_space<vmem>>, vector<256x128xf32>
      %cst_12 = arith.constant 0.000000e+00 : f32
      %13 = vector.broadcast %cst_12 : f32 to vector<256x128xf32>
      %14 = arith.cmpf oge, %12, %13 : vector<256x128xf32>
      %cst_13 = arith.constant 2.000000e-01 : f32
      %15 = vector.broadcast %cst_13 : f32 to vector<256x128xf32>
      %16 = arith.mulf %12, %15 : vector<256x128xf32>
      %17 = arith.select %14, %12, %16 : vector<256x128xi1>, vector<256x128xf32>
      %c0_14 = arith.constant 0 : index
      %c0_15 = arith.constant 0 : index
      %18 = vector.load %arg6[%c0_14, %c0_15] : memref<256x128xf32, #tpu.memory_space<vmem>>, vector<256x128xf32>
      tpu.vector_store %arg6[%c0_14, %c0_15], %17 {strides = array<i32>} : memref<256x128xf32, #tpu.memory_space<vmem>>, vector<256x128xf32>,
    } else {
    }
    return
  }
  func.func @transform_0(%arg0: i32, %arg1: i32) -> (i32, i32) {
    %c0_i32 = arith.constant 0 : i32
    return %arg0, %arg1 : i32, i32
  }
  func.func @transform_1(%arg0: i32, %arg1: i32) -> (i32, i32) {
    %c0_i32 = arith.constant 0 : i32
    %c0_i32_0 = arith.constant 0 : i32
    return %arg1, %c0_i32 : i32, i32
  }
  func.func @transform_2(%arg0: i32, %arg1: i32) -> (i32, i32) {
    %c0_i32 = arith.constant 0 : i32
    %c0_i32_0 = arith.constant 0 : i32
    %c0_i32_1 = arith.constant 0 : i32
    return %c0_i32, %c0_i32_0 : i32, i32
  }
  func.func @transform_3(%arg0: i32, %arg1: i32) -> (i32, i32) {
    %c0_i32 = arith.constant 0 : i32
    %c0_i32_0 = arith.constant 0 : i32
    return %arg0, %c0_i32 : i32, i32
  }
  func.func @transform_4(%arg0: i32, %arg1: i32) -> (i32, i32) {
    %c0_i32 = arith.constant 0 : i32
    %c0_i32_0 = arith.constant 0 : i32
    return %arg0, %c0_i32 : i32, i32
  }
}

module attributes {stable_mosaic.version = 11 : i64} {
  func.func @_conv_lrelu_kernel(%arg0: i32, %arg1: i32, %arg2: memref<200x128xbf16, #tpu.memory_space<vmem>>, %arg3: memref<128x128xbf16, #tpu.memory_space<vmem>>, %arg4: memref<1x128xf32, #tpu.memory_space<vmem>>, %arg5: memref<200x128xf32, #tpu.memory_space<vmem>>, %arg6: memref<200x128xf32, #tpu.memory_space<vmem>>) attributes {dimension_semantics = [#tpu.dimension_semantics<parallel>, #tpu.dimension_semantics<arbitrary>], iteration_bounds = array<i64: 1, 1>, scalar_prefetch = 0 : i64, scratch_operands = 0 : i64, tpu.core_type = #tpu.core_type<tc>, window_params = [{transform_indices = @transform_0, window_bounds = array<i64: 200, 128>}, {transform_indices = @transform_1, window_bounds = array<i64: 128, 128>}, {pipeline_mode = #tpu.pipeline_mode<synchronous>, transform_indices = @transform_2, window_bounds = array<i64: 1, 128>}, {transform_indices = @transform_3, window_bounds = array<i64: 200, 128>}, {transform_indices = @transform_4, window_bounds = array<i64: 200, 128>}]} {
    %c0_i32 = arith.constant 0 : i32
    %0 = arith.cmpi eq, %arg1, %c0_i32 : i32
    %1 = arith.extui %0 : i1 to i32
    %c0_i32_0 = arith.constant 0 : i32
    %2 = arith.cmpi ne, %1, %c0_i32_0 : i32
    scf.if %2 {
      %c0_10 = arith.constant 0 : index
      %c0_11 = arith.constant 0 : index
      %12 = vector.load %arg4[%c0_10, %c0_11] : memref<1x128xf32, #tpu.memory_space<vmem>>, vector<1x128xf32>
      %13 = vector.shape_cast %12 : vector<1x128xf32> to vector<1x128xf32>
      %14 = vector.broadcast %13 : vector<1x128xf32> to vector<200x128xf32>
      %c0_12 = arith.constant 0 : index
      %c0_13 = arith.constant 0 : index
      %15 = vector.load %arg5[%c0_12, %c0_13] : memref<200x128xf32, #tpu.memory_space<vmem>>, vector<200x128xf32>
      tpu.vector_store %arg5[%c0_12, %c0_13], %14 {strides = array<i32>} : memref<200x128xf32, #tpu.memory_space<vmem>>, vector<200x128xf32>,
    } else {
    }
    %c0 = arith.constant 0 : index
    %c0_1 = arith.constant 0 : index
    %3 = vector.load %arg5[%c0, %c0_1] : memref<200x128xf32, #tpu.memory_space<vmem>>, vector<200x128xf32>
    %c0_2 = arith.constant 0 : index
    %c0_3 = arith.constant 0 : index
    %4 = vector.load %arg2[%c0_2, %c0_3] : memref<200x128xbf16, #tpu.memory_space<vmem>>, vector<200x128xbf16>
    %c0_4 = arith.constant 0 : index
    %c0_5 = arith.constant 0 : index
    %5 = vector.load %arg3[%c0_4, %c0_5] : memref<128x128xbf16, #tpu.memory_space<vmem>>, vector<128x128xbf16>
    %cst = arith.constant dense<0.000000e+00> : vector<200x128xf32>
    %6 = tpu.matmul %4, %5, %cst {dimension_numbers = #tpu.dot_dimension_numbers<[1], [0], [0], [1], [0, 0, 1, 1], [], []>} : vector<200x128xbf16>, vector<128x128xbf16>, vector<200x128xf32> -> vector<200x128xf32>
    %7 = arith.addf %3, %6 : vector<200x128xf32>
    %c0_6 = arith.constant 0 : index
    %c0_7 = arith.constant 0 : index
    %8 = vector.load %arg5[%c0_6, %c0_7] : memref<200x128xf32, #tpu.memory_space<vmem>>, vector<200x128xf32>
    tpu.vector_store %arg5[%c0_6, %c0_7], %7 {strides = array<i32>} : memref<200x128xf32, #tpu.memory_space<vmem>>, vector<200x128xf32>,
    %c0_i32_8 = arith.constant 0 : i32
    %9 = arith.cmpi eq, %arg1, %c0_i32_8 : i32
    %10 = arith.extui %9 : i1 to i32
    %c0_i32_9 = arith.constant 0 : i32
    %11 = arith.cmpi ne, %10, %c0_i32_9 : i32
    scf.if %11 {
      %c0_10 = arith.constant 0 : index
      %c0_11 = arith.constant 0 : index
      %12 = vector.load %arg5[%c0_10, %c0_11] : memref<200x128xf32, #tpu.memory_space<vmem>>, vector<200x128xf32>
      %cst_12 = arith.constant 0.000000e+00 : f32
      %13 = vector.broadcast %cst_12 : f32 to vector<200x128xf32>
      %14 = arith.cmpf oge, %12, %13 : vector<200x128xf32>
      %cst_13 = arith.constant 2.000000e-01 : f32
      %15 = vector.broadcast %cst_13 : f32 to vector<200x128xf32>
      %16 = arith.mulf %12, %15 : vector<200x128xf32>
      %17 = arith.select %14, %12, %16 : vector<200x128xi1>, vector<200x128xf32>
      %c0_14 = arith.constant 0 : index
      %c0_15 = arith.constant 0 : index
      %18 = vector.load %arg6[%c0_14, %c0_15] : memref<200x128xf32, #tpu.memory_space<vmem>>, vector<200x128xf32>
      tpu.vector_store %arg6[%c0_14, %c0_15], %17 {strides = array<i32>} : memref<200x128xf32, #tpu.memory_space<vmem>>, vector<200x128xf32>,
    } else {
    }
    return
  }
  func.func @transform_0(%arg0: i32, %arg1: i32) -> (i32, i32) {
    %c0_i32 = arith.constant 0 : i32
    return %arg0, %arg1 : i32, i32
  }
  func.func @transform_1(%arg0: i32, %arg1: i32) -> (i32, i32) {
    %c0_i32 = arith.constant 0 : i32
    %c0_i32_0 = arith.constant 0 : i32
    return %arg1, %c0_i32 : i32, i32
  }
  func.func @transform_2(%arg0: i32, %arg1: i32) -> (i32, i32) {
    %c0_i32 = arith.constant 0 : i32
    %c0_i32_0 = arith.constant 0 : i32
    %c0_i32_1 = arith.constant 0 : i32
    return %c0_i32, %c0_i32_0 : i32, i32
  }
  func.func @transform_3(%arg0: i32, %arg1: i32) -> (i32, i32) {
    %c0_i32 = arith.constant 0 : i32
    %c0_i32_0 = arith.constant 0 : i32
    return %arg0, %c0_i32 : i32, i32
  }
  func.func @transform_4(%arg0: i32, %arg1: i32) -> (i32, i32) {
    %c0_i32 = arith.constant 0 : i32
    %c0_i32_0 = arith.constant 0 : i32
    return %arg0, %c0_i32 : i32, i32
  }
}

module attributes {stable_mosaic.version = 11 : i64} {
  func.func @_conv_kernel(%arg0: i32, %arg1: i32, %arg2: memref<144x256xbf16, #tpu.memory_space<vmem>>, %arg3: memref<256x128xbf16, #tpu.memory_space<vmem>>, %arg4: memref<1x128xf32, #tpu.memory_space<vmem>>, %arg5: memref<144x128xf32, #tpu.memory_space<vmem>>) attributes {dimension_semantics = [#tpu.dimension_semantics<parallel>, #tpu.dimension_semantics<arbitrary>], iteration_bounds = array<i64: 1, 1>, scalar_prefetch = 0 : i64, scratch_operands = 0 : i64, tpu.core_type = #tpu.core_type<tc>, window_params = [{transform_indices = @transform_0, window_bounds = array<i64: 144, 256>}, {transform_indices = @transform_1, window_bounds = array<i64: 256, 128>}, {pipeline_mode = #tpu.pipeline_mode<synchronous>, transform_indices = @transform_2, window_bounds = array<i64: 1, 128>}, {transform_indices = @transform_3, window_bounds = array<i64: 144, 128>}]} {
    %c0_i32 = arith.constant 0 : i32
    %0 = arith.cmpi eq, %arg1, %c0_i32 : i32
    %1 = arith.extui %0 : i1 to i32
    %c0_i32_0 = arith.constant 0 : i32
    %2 = arith.cmpi ne, %1, %c0_i32_0 : i32
    scf.if %2 {
      %c0_8 = arith.constant 0 : index
      %c0_9 = arith.constant 0 : index
      %9 = vector.load %arg4[%c0_8, %c0_9] : memref<1x128xf32, #tpu.memory_space<vmem>>, vector<1x128xf32>
      %10 = vector.shape_cast %9 : vector<1x128xf32> to vector<1x128xf32>
      %11 = vector.broadcast %10 : vector<1x128xf32> to vector<144x128xf32>
      %c0_10 = arith.constant 0 : index
      %c0_11 = arith.constant 0 : index
      %12 = vector.load %arg5[%c0_10, %c0_11] : memref<144x128xf32, #tpu.memory_space<vmem>>, vector<144x128xf32>
      tpu.vector_store %arg5[%c0_10, %c0_11], %11 {strides = array<i32>} : memref<144x128xf32, #tpu.memory_space<vmem>>, vector<144x128xf32>,
    } else {
    }
    %c0 = arith.constant 0 : index
    %c0_1 = arith.constant 0 : index
    %3 = vector.load %arg5[%c0, %c0_1] : memref<144x128xf32, #tpu.memory_space<vmem>>, vector<144x128xf32>
    %c0_2 = arith.constant 0 : index
    %c0_3 = arith.constant 0 : index
    %4 = vector.load %arg2[%c0_2, %c0_3] : memref<144x256xbf16, #tpu.memory_space<vmem>>, vector<144x256xbf16>
    %c0_4 = arith.constant 0 : index
    %c0_5 = arith.constant 0 : index
    %5 = vector.load %arg3[%c0_4, %c0_5] : memref<256x128xbf16, #tpu.memory_space<vmem>>, vector<256x128xbf16>
    %cst = arith.constant dense<0.000000e+00> : vector<144x128xf32>
    %6 = tpu.matmul %4, %5, %cst {dimension_numbers = #tpu.dot_dimension_numbers<[1], [0], [0], [1], [0, 0, 1, 1], [], []>} : vector<144x256xbf16>, vector<256x128xbf16>, vector<144x128xf32> -> vector<144x128xf32>
    %7 = arith.addf %3, %6 : vector<144x128xf32>
    %c0_6 = arith.constant 0 : index
    %c0_7 = arith.constant 0 : index
    %8 = vector.load %arg5[%c0_6, %c0_7] : memref<144x128xf32, #tpu.memory_space<vmem>>, vector<144x128xf32>
    tpu.vector_store %arg5[%c0_6, %c0_7], %7 {strides = array<i32>} : memref<144x128xf32, #tpu.memory_space<vmem>>, vector<144x128xf32>,
    return
  }
  func.func @transform_0(%arg0: i32, %arg1: i32) -> (i32, i32) {
    %c0_i32 = arith.constant 0 : i32
    return %arg0, %arg1 : i32, i32
  }
  func.func @transform_1(%arg0: i32, %arg1: i32) -> (i32, i32) {
    %c0_i32 = arith.constant 0 : i32
    %c0_i32_0 = arith.constant 0 : i32
    return %arg1, %c0_i32 : i32, i32
  }
  func.func @transform_2(%arg0: i32, %arg1: i32) -> (i32, i32) {
    %c0_i32 = arith.constant 0 : i32
    %c0_i32_0 = arith.constant 0 : i32
    %c0_i32_1 = arith.constant 0 : i32
    return %c0_i32, %c0_i32_0 : i32, i32
  }
  func.func @transform_3(%arg0: i32, %arg1: i32) -> (i32, i32) {
    %c0_i32 = arith.constant 0 : i32
    %c0_i32_0 = arith.constant 0 : i32
    return %arg0, %c0_i32 : i32, i32
  }
}

module attributes {stable_mosaic.version = 11 : i64} {
  func.func @_conv_lrelu_kernel(%arg0: i32, %arg1: i32, %arg2: memref<64x128xbf16, #tpu.memory_space<vmem>>, %arg3: memref<128x128xbf16, #tpu.memory_space<vmem>>, %arg4: memref<1x128xf32, #tpu.memory_space<vmem>>, %arg5: memref<64x128xf32, #tpu.memory_space<vmem>>, %arg6: memref<64x128xf32, #tpu.memory_space<vmem>>) attributes {dimension_semantics = [#tpu.dimension_semantics<parallel>, #tpu.dimension_semantics<arbitrary>], iteration_bounds = array<i64: 1, 1>, scalar_prefetch = 0 : i64, scratch_operands = 0 : i64, tpu.core_type = #tpu.core_type<tc>, window_params = [{transform_indices = @transform_0, window_bounds = array<i64: 64, 128>}, {transform_indices = @transform_1, window_bounds = array<i64: 128, 128>}, {pipeline_mode = #tpu.pipeline_mode<synchronous>, transform_indices = @transform_2, window_bounds = array<i64: 1, 128>}, {transform_indices = @transform_3, window_bounds = array<i64: 64, 128>}, {transform_indices = @transform_4, window_bounds = array<i64: 64, 128>}]} {
    %c0_i32 = arith.constant 0 : i32
    %0 = arith.cmpi eq, %arg1, %c0_i32 : i32
    %1 = arith.extui %0 : i1 to i32
    %c0_i32_0 = arith.constant 0 : i32
    %2 = arith.cmpi ne, %1, %c0_i32_0 : i32
    scf.if %2 {
      %c0_10 = arith.constant 0 : index
      %c0_11 = arith.constant 0 : index
      %12 = vector.load %arg4[%c0_10, %c0_11] : memref<1x128xf32, #tpu.memory_space<vmem>>, vector<1x128xf32>
      %13 = vector.shape_cast %12 : vector<1x128xf32> to vector<1x128xf32>
      %14 = vector.broadcast %13 : vector<1x128xf32> to vector<64x128xf32>
      %c0_12 = arith.constant 0 : index
      %c0_13 = arith.constant 0 : index
      %15 = vector.load %arg5[%c0_12, %c0_13] : memref<64x128xf32, #tpu.memory_space<vmem>>, vector<64x128xf32>
      tpu.vector_store %arg5[%c0_12, %c0_13], %14 {strides = array<i32>} : memref<64x128xf32, #tpu.memory_space<vmem>>, vector<64x128xf32>,
    } else {
    }
    %c0 = arith.constant 0 : index
    %c0_1 = arith.constant 0 : index
    %3 = vector.load %arg5[%c0, %c0_1] : memref<64x128xf32, #tpu.memory_space<vmem>>, vector<64x128xf32>
    %c0_2 = arith.constant 0 : index
    %c0_3 = arith.constant 0 : index
    %4 = vector.load %arg2[%c0_2, %c0_3] : memref<64x128xbf16, #tpu.memory_space<vmem>>, vector<64x128xbf16>
    %c0_4 = arith.constant 0 : index
    %c0_5 = arith.constant 0 : index
    %5 = vector.load %arg3[%c0_4, %c0_5] : memref<128x128xbf16, #tpu.memory_space<vmem>>, vector<128x128xbf16>
    %cst = arith.constant dense<0.000000e+00> : vector<64x128xf32>
    %6 = tpu.matmul %4, %5, %cst {dimension_numbers = #tpu.dot_dimension_numbers<[1], [0], [0], [1], [0, 0, 1, 1], [], []>} : vector<64x128xbf16>, vector<128x128xbf16>, vector<64x128xf32> -> vector<64x128xf32>
    %7 = arith.addf %3, %6 : vector<64x128xf32>
    %c0_6 = arith.constant 0 : index
    %c0_7 = arith.constant 0 : index
    %8 = vector.load %arg5[%c0_6, %c0_7] : memref<64x128xf32, #tpu.memory_space<vmem>>, vector<64x128xf32>
    tpu.vector_store %arg5[%c0_6, %c0_7], %7 {strides = array<i32>} : memref<64x128xf32, #tpu.memory_space<vmem>>, vector<64x128xf32>,
    %c0_i32_8 = arith.constant 0 : i32
    %9 = arith.cmpi eq, %arg1, %c0_i32_8 : i32
    %10 = arith.extui %9 : i1 to i32
    %c0_i32_9 = arith.constant 0 : i32
    %11 = arith.cmpi ne, %10, %c0_i32_9 : i32
    scf.if %11 {
      %c0_10 = arith.constant 0 : index
      %c0_11 = arith.constant 0 : index
      %12 = vector.load %arg5[%c0_10, %c0_11] : memref<64x128xf32, #tpu.memory_space<vmem>>, vector<64x128xf32>
      %cst_12 = arith.constant 0.000000e+00 : f32
      %13 = vector.broadcast %cst_12 : f32 to vector<64x128xf32>
      %14 = arith.cmpf oge, %12, %13 : vector<64x128xf32>
      %cst_13 = arith.constant 2.000000e-01 : f32
      %15 = vector.broadcast %cst_13 : f32 to vector<64x128xf32>
      %16 = arith.mulf %12, %15 : vector<64x128xf32>
      %17 = arith.select %14, %12, %16 : vector<64x128xi1>, vector<64x128xf32>
      %c0_14 = arith.constant 0 : index
      %c0_15 = arith.constant 0 : index
      %18 = vector.load %arg6[%c0_14, %c0_15] : memref<64x128xf32, #tpu.memory_space<vmem>>, vector<64x128xf32>
      tpu.vector_store %arg6[%c0_14, %c0_15], %17 {strides = array<i32>} : memref<64x128xf32, #tpu.memory_space<vmem>>, vector<64x128xf32>,
    } else {
    }
    return
  }
  func.func @transform_0(%arg0: i32, %arg1: i32) -> (i32, i32) {
    %c0_i32 = arith.constant 0 : i32
    return %arg0, %arg1 : i32, i32
  }
  func.func @transform_1(%arg0: i32, %arg1: i32) -> (i32, i32) {
    %c0_i32 = arith.constant 0 : i32
    %c0_i32_0 = arith.constant 0 : i32
    return %arg1, %c0_i32 : i32, i32
  }
  func.func @transform_2(%arg0: i32, %arg1: i32) -> (i32, i32) {
    %c0_i32 = arith.constant 0 : i32
    %c0_i32_0 = arith.constant 0 : i32
    %c0_i32_1 = arith.constant 0 : i32
    return %c0_i32, %c0_i32_0 : i32, i32
  }
  func.func @transform_3(%arg0: i32, %arg1: i32) -> (i32, i32) {
    %c0_i32 = arith.constant 0 : i32
    %c0_i32_0 = arith.constant 0 : i32
    return %arg0, %c0_i32 : i32, i32
  }
  func.func @transform_4(%arg0: i32, %arg1: i32) -> (i32, i32) {
    %c0_i32 = arith.constant 0 : i32
    %c0_i32_0 = arith.constant 0 : i32
    return %arg0, %c0_i32 : i32, i32
  }
}

module attributes {stable_mosaic.version = 11 : i64} {
  func.func @_conv_lrelu_kernel(%arg0: i32, %arg1: i32, %arg2: memref<40x128xbf16, #tpu.memory_space<vmem>>, %arg3: memref<128x128xbf16, #tpu.memory_space<vmem>>, %arg4: memref<1x128xf32, #tpu.memory_space<vmem>>, %arg5: memref<40x128xf32, #tpu.memory_space<vmem>>, %arg6: memref<40x128xf32, #tpu.memory_space<vmem>>) attributes {dimension_semantics = [#tpu.dimension_semantics<parallel>, #tpu.dimension_semantics<arbitrary>], iteration_bounds = array<i64: 1, 1>, scalar_prefetch = 0 : i64, scratch_operands = 0 : i64, tpu.core_type = #tpu.core_type<tc>, window_params = [{transform_indices = @transform_0, window_bounds = array<i64: 40, 128>}, {transform_indices = @transform_1, window_bounds = array<i64: 128, 128>}, {pipeline_mode = #tpu.pipeline_mode<synchronous>, transform_indices = @transform_2, window_bounds = array<i64: 1, 128>}, {transform_indices = @transform_3, window_bounds = array<i64: 40, 128>}, {transform_indices = @transform_4, window_bounds = array<i64: 40, 128>}]} {
    %c0_i32 = arith.constant 0 : i32
    %0 = arith.cmpi eq, %arg1, %c0_i32 : i32
    %1 = arith.extui %0 : i1 to i32
    %c0_i32_0 = arith.constant 0 : i32
    %2 = arith.cmpi ne, %1, %c0_i32_0 : i32
    scf.if %2 {
      %c0_10 = arith.constant 0 : index
      %c0_11 = arith.constant 0 : index
      %12 = vector.load %arg4[%c0_10, %c0_11] : memref<1x128xf32, #tpu.memory_space<vmem>>, vector<1x128xf32>
      %13 = vector.shape_cast %12 : vector<1x128xf32> to vector<1x128xf32>
      %14 = vector.broadcast %13 : vector<1x128xf32> to vector<40x128xf32>
      %c0_12 = arith.constant 0 : index
      %c0_13 = arith.constant 0 : index
      %15 = vector.load %arg5[%c0_12, %c0_13] : memref<40x128xf32, #tpu.memory_space<vmem>>, vector<40x128xf32>
      tpu.vector_store %arg5[%c0_12, %c0_13], %14 {strides = array<i32>} : memref<40x128xf32, #tpu.memory_space<vmem>>, vector<40x128xf32>,
    } else {
    }
    %c0 = arith.constant 0 : index
    %c0_1 = arith.constant 0 : index
    %3 = vector.load %arg5[%c0, %c0_1] : memref<40x128xf32, #tpu.memory_space<vmem>>, vector<40x128xf32>
    %c0_2 = arith.constant 0 : index
    %c0_3 = arith.constant 0 : index
    %4 = vector.load %arg2[%c0_2, %c0_3] : memref<40x128xbf16, #tpu.memory_space<vmem>>, vector<40x128xbf16>
    %c0_4 = arith.constant 0 : index
    %c0_5 = arith.constant 0 : index
    %5 = vector.load %arg3[%c0_4, %c0_5] : memref<128x128xbf16, #tpu.memory_space<vmem>>, vector<128x128xbf16>
    %cst = arith.constant dense<0.000000e+00> : vector<40x128xf32>
    %6 = tpu.matmul %4, %5, %cst {dimension_numbers = #tpu.dot_dimension_numbers<[1], [0], [0], [1], [0, 0, 1, 1], [], []>} : vector<40x128xbf16>, vector<128x128xbf16>, vector<40x128xf32> -> vector<40x128xf32>
    %7 = arith.addf %3, %6 : vector<40x128xf32>
    %c0_6 = arith.constant 0 : index
    %c0_7 = arith.constant 0 : index
    %8 = vector.load %arg5[%c0_6, %c0_7] : memref<40x128xf32, #tpu.memory_space<vmem>>, vector<40x128xf32>
    tpu.vector_store %arg5[%c0_6, %c0_7], %7 {strides = array<i32>} : memref<40x128xf32, #tpu.memory_space<vmem>>, vector<40x128xf32>,
    %c0_i32_8 = arith.constant 0 : i32
    %9 = arith.cmpi eq, %arg1, %c0_i32_8 : i32
    %10 = arith.extui %9 : i1 to i32
    %c0_i32_9 = arith.constant 0 : i32
    %11 = arith.cmpi ne, %10, %c0_i32_9 : i32
    scf.if %11 {
      %c0_10 = arith.constant 0 : index
      %c0_11 = arith.constant 0 : index
      %12 = vector.load %arg5[%c0_10, %c0_11] : memref<40x128xf32, #tpu.memory_space<vmem>>, vector<40x128xf32>
      %cst_12 = arith.constant 0.000000e+00 : f32
      %13 = vector.broadcast %cst_12 : f32 to vector<40x128xf32>
      %14 = arith.cmpf oge, %12, %13 : vector<40x128xf32>
      %cst_13 = arith.constant 2.000000e-01 : f32
      %15 = vector.broadcast %cst_13 : f32 to vector<40x128xf32>
      %16 = arith.mulf %12, %15 : vector<40x128xf32>
      %17 = arith.select %14, %12, %16 : vector<40x128xi1>, vector<40x128xf32>
      %c0_14 = arith.constant 0 : index
      %c0_15 = arith.constant 0 : index
      %18 = vector.load %arg6[%c0_14, %c0_15] : memref<40x128xf32, #tpu.memory_space<vmem>>, vector<40x128xf32>
      tpu.vector_store %arg6[%c0_14, %c0_15], %17 {strides = array<i32>} : memref<40x128xf32, #tpu.memory_space<vmem>>, vector<40x128xf32>,
    } else {
    }
    return
  }
  func.func @transform_0(%arg0: i32, %arg1: i32) -> (i32, i32) {
    %c0_i32 = arith.constant 0 : i32
    return %arg0, %arg1 : i32, i32
  }
  func.func @transform_1(%arg0: i32, %arg1: i32) -> (i32, i32) {
    %c0_i32 = arith.constant 0 : i32
    %c0_i32_0 = arith.constant 0 : i32
    return %arg1, %c0_i32 : i32, i32
  }
  func.func @transform_2(%arg0: i32, %arg1: i32) -> (i32, i32) {
    %c0_i32 = arith.constant 0 : i32
    %c0_i32_0 = arith.constant 0 : i32
    %c0_i32_1 = arith.constant 0 : i32
    return %c0_i32, %c0_i32_0 : i32, i32
  }
  func.func @transform_3(%arg0: i32, %arg1: i32) -> (i32, i32) {
    %c0_i32 = arith.constant 0 : i32
    %c0_i32_0 = arith.constant 0 : i32
    return %arg0, %c0_i32 : i32, i32
  }
  func.func @transform_4(%arg0: i32, %arg1: i32) -> (i32, i32) {
    %c0_i32 = arith.constant 0 : i32
    %c0_i32_0 = arith.constant 0 : i32
    return %arg0, %c0_i32 : i32, i32
  }
}

module attributes {stable_mosaic.version = 11 : i64} {
  func.func @_conv_kernel(%arg0: i32, %arg1: i32, %arg2: memref<16x256xbf16, #tpu.memory_space<vmem>>, %arg3: memref<256x128xbf16, #tpu.memory_space<vmem>>, %arg4: memref<1x128xf32, #tpu.memory_space<vmem>>, %arg5: memref<16x128xf32, #tpu.memory_space<vmem>>) attributes {dimension_semantics = [#tpu.dimension_semantics<parallel>, #tpu.dimension_semantics<arbitrary>], iteration_bounds = array<i64: 1, 1>, scalar_prefetch = 0 : i64, scratch_operands = 0 : i64, tpu.core_type = #tpu.core_type<tc>, window_params = [{transform_indices = @transform_0, window_bounds = array<i64: 16, 256>}, {transform_indices = @transform_1, window_bounds = array<i64: 256, 128>}, {pipeline_mode = #tpu.pipeline_mode<synchronous>, transform_indices = @transform_2, window_bounds = array<i64: 1, 128>}, {transform_indices = @transform_3, window_bounds = array<i64: 16, 128>}]} {
    %c0_i32 = arith.constant 0 : i32
    %0 = arith.cmpi eq, %arg1, %c0_i32 : i32
    %1 = arith.extui %0 : i1 to i32
    %c0_i32_0 = arith.constant 0 : i32
    %2 = arith.cmpi ne, %1, %c0_i32_0 : i32
    scf.if %2 {
      %c0_8 = arith.constant 0 : index
      %c0_9 = arith.constant 0 : index
      %9 = vector.load %arg4[%c0_8, %c0_9] : memref<1x128xf32, #tpu.memory_space<vmem>>, vector<1x128xf32>
      %10 = vector.shape_cast %9 : vector<1x128xf32> to vector<1x128xf32>
      %11 = vector.broadcast %10 : vector<1x128xf32> to vector<16x128xf32>
      %c0_10 = arith.constant 0 : index
      %c0_11 = arith.constant 0 : index
      %12 = vector.load %arg5[%c0_10, %c0_11] : memref<16x128xf32, #tpu.memory_space<vmem>>, vector<16x128xf32>
      tpu.vector_store %arg5[%c0_10, %c0_11], %11 {strides = array<i32>} : memref<16x128xf32, #tpu.memory_space<vmem>>, vector<16x128xf32>,
    } else {
    }
    %c0 = arith.constant 0 : index
    %c0_1 = arith.constant 0 : index
    %3 = vector.load %arg5[%c0, %c0_1] : memref<16x128xf32, #tpu.memory_space<vmem>>, vector<16x128xf32>
    %c0_2 = arith.constant 0 : index
    %c0_3 = arith.constant 0 : index
    %4 = vector.load %arg2[%c0_2, %c0_3] : memref<16x256xbf16, #tpu.memory_space<vmem>>, vector<16x256xbf16>
    %c0_4 = arith.constant 0 : index
    %c0_5 = arith.constant 0 : index
    %5 = vector.load %arg3[%c0_4, %c0_5] : memref<256x128xbf16, #tpu.memory_space<vmem>>, vector<256x128xbf16>
    %cst = arith.constant dense<0.000000e+00> : vector<16x128xf32>
    %6 = tpu.matmul %4, %5, %cst {dimension_numbers = #tpu.dot_dimension_numbers<[1], [0], [0], [1], [0, 0, 1, 1], [], []>} : vector<16x256xbf16>, vector<256x128xbf16>, vector<16x128xf32> -> vector<16x128xf32>
    %7 = arith.addf %3, %6 : vector<16x128xf32>
    %c0_6 = arith.constant 0 : index
    %c0_7 = arith.constant 0 : index
    %8 = vector.load %arg5[%c0_6, %c0_7] : memref<16x128xf32, #tpu.memory_space<vmem>>, vector<16x128xf32>
    tpu.vector_store %arg5[%c0_6, %c0_7], %7 {strides = array<i32>} : memref<16x128xf32, #tpu.memory_space<vmem>>, vector<16x128xf32>,
    return
  }
  func.func @transform_0(%arg0: i32, %arg1: i32) -> (i32, i32) {
    %c0_i32 = arith.constant 0 : i32
    return %arg0, %arg1 : i32, i32
  }
  func.func @transform_1(%arg0: i32, %arg1: i32) -> (i32, i32) {
    %c0_i32 = arith.constant 0 : i32
    %c0_i32_0 = arith.constant 0 : i32
    return %arg1, %c0_i32 : i32, i32
  }
  func.func @transform_2(%arg0: i32, %arg1: i32) -> (i32, i32) {
    %c0_i32 = arith.constant 0 : i32
    %c0_i32_0 = arith.constant 0 : i32
    %c0_i32_1 = arith.constant 0 : i32
    return %c0_i32, %c0_i32_0 : i32, i32
  }
  func.func @transform_3(%arg0: i32, %arg1: i32) -> (i32, i32) {
    %c0_i32 = arith.constant 0 : i32
    %c0_i32_0 = arith.constant 0 : i32
    return %arg0, %c0_i32 : i32, i32
  }
}

</mosaic_0001>

<bundles_post_ra>
// kernel: multiscale_forward.6
= control target key start
LH: loop header
LB: loop body
LE: loop exit
PB: predicated region body
PF: predicated region fallthrough
CT: control target
= control target key end

     0   :  { %s1143_s1 = inlined_call_operand.vmem [shape: bf16[128,128], index: 1, kind: input, shape index: {}]   ;;  %s1144_s0 = inlined_call_operand.vmem [shape: bf16[256,128], index: 0, kind: input, shape index: {}]   ;;  %s1145_s2 = inlined_call_operand.vmem [shape: f32[1,128], index: 2, kind: input, shape index: {}]   ;;  %s1146_s3 = inlined_call_operand.vmem [shape: f32[256,128], index: 3, kind: output, shape index: {0}]   ;;  %s1147_s4 = inlined_call_operand.vmem [shape: f32[256,128], index: 4, kind: output, shape index: {1}]  }
   0x1   :  { %v793_v0 = vld [vmem:[%s1143_s1 + $0x38] sm:$0xff]   ;;  %v794_v1 = vld [vmem:[%s1143_s1 + $0x30] sm:$0xff]   ;;  %v795_v2 = vld [vmem:[%s1143_s1 + $0x28] sm:$0xff]  }
   0x2   :  { %729 = vmatprep.subr.bf16.mxu0 %v793_v0  ;;  %777 = vmatprep.subr.bf16.mxu1 %v793_v0  ;;  %v796_v3 = vld [vmem:[%s1143_s1 + $0x20] sm:$0xff]   ;;  %v797_v6 = vld [vmem:[%s1143_s1 + $0x18] sm:$0xff]   ;;  %v798_v7 = vld [vmem:[%s1143_s1 + $0x10] sm:$0xff]  }
   0x3   :  { %730 = vmatpush3.bf16.msra.mxu0 %v793_v0  ;;  %785 = vmatpush3.bf16.msra.mxu1 %v793_v0  ;;  %v801_v4 = vld [vmem:[%s1144_s0] sm:$0xff]   ;;  %v799_v8 = vld [vmem:[%s1143_s1 + $0x8] sm:$0xff]   ;;  %v805_v12 = vld [vmem:[%s1144_s0 + $0x10] sm:$0xff]  }
   0x4   :  { %731 = vmatprep.subr.bf16.mxu0 %v794_v1  ;;  %778 = vmatprep.subr.bf16.mxu1 %v794_v1  ;;  %v802_v5 = vld [vmem:[%s1144_s0 + $0x40] sm:$0xff]   ;;  %v803_v10 = vld [vmem:[%s1144_s0 + $0x8] sm:$0xff]   ;;  %v806_v13 = vld [vmem:[%s1144_s0 + $0x50] sm:$0xff]  }
   0x5   :  { %745 = vmatprep.mubr.bf16.mxu0 %v801_v4  ;;  %761 = vmatprep.mubr.bf16.mxu1 %v802_v5  ;;  %v800_v9 = vld [vmem:[%s1143_s1] sm:$0xff]   ;;  %v804_v11 = vld [vmem:[%s1144_s0 + $0x48] sm:$0xff]   ;;  %v807_v14 = vld [vmem:[%s1144_s0 + $0x18] sm:$0xff]  }
   0x6   :  { %v808_v15 = vld [vmem:[%s1144_s0 + $0x58] sm:$0xff]   ;;  %v809_v16 = vld [vmem:[%s1144_s0 + $0x20] sm:$0xff]   ;;  %v811_v18 = vld [vmem:[%s1144_s0 + $0x28] sm:$0xff]  }
   0x7   :  { %732 = vmatpush3.bf16.msra.mxu0 %v794_v1  ;;  %786 = vmatpush3.bf16.msra.mxu1 %v794_v1  ;;  %v810_v17 = vld [vmem:[%s1144_s0 + $0x60] sm:$0xff]   ;;  %v812_v19 = vld [vmem:[%s1144_s0 + $0x68] sm:$0xff]   ;;  %v813_v20 = vld [vmem:[%s1144_s0 + $0x30] sm:$0xff]  }
   0x8   :  { %733 = vmatprep.subr.bf16.mxu0 %v795_v2  ;;  %779 = vmatprep.subr.bf16.mxu1 %v795_v2  ;;  %v814_v21 = vld [vmem:[%s1144_s0 + $0x70] sm:$0xff]   ;;  %v815_v22 = vld [vmem:[%s1144_s0 + $0x38] sm:$0xff]   ;;  %v917_v24 = vld [vmem:[%s1145_s2] ss:$0 sm:$0xff] }
   0x9   :  { %v816_v23 = vld [vmem:[%s1144_s0 + $0x78] sm:$0xff]  }
   0xb   :  { %734 = vmatpush3.bf16.msra.mxu0 %v795_v2  ;;  %787 = vmatpush3.bf16.msra.mxu1 %v795_v2 }
   0xc   :  { %735 = vmatprep.subr.bf16.mxu0 %v796_v3  ;;  %780 = vmatprep.subr.bf16.mxu1 %v796_v3 }
   0xf   :  { %736 = vmatpush3.bf16.msra.mxu0 %v796_v3  ;;  %788 = vmatpush3.bf16.msra.mxu1 %v796_v3 }
  0x10   :  { %737 = vmatprep.subr.bf16.mxu0 %v797_v6  ;;  %781 = vmatprep.subr.bf16.mxu1 %v797_v6 }
  0x13   :  { %738 = vmatpush3.bf16.msra.mxu0 %v797_v6  ;;  %789 = vmatpush3.bf16.msra.mxu1 %v797_v6 }
  0x14   :  { %739 = vmatprep.subr.bf16.mxu0 %v798_v7  ;;  %782 = vmatprep.subr.bf16.mxu1 %v798_v7 }
  0x17   :  { %740 = vmatpush3.bf16.msra.mxu0 %v798_v7  ;;  %790 = vmatpush3.bf16.msra.mxu1 %v798_v7 }
  0x18   :  { %741 = vmatprep.subr.bf16.mxu0 %v799_v8  ;;  %783 = vmatprep.subr.bf16.mxu1 %v799_v8 }
  0x1b   :  { %742 = vmatpush3.bf16.msra.mxu0 %v799_v8  ;;  %791 = vmatpush3.bf16.msra.mxu1 %v799_v8 }
  0x1c   :  { %743 = vmatprep.subr.bf16.mxu0 %v800_v9  ;;  %784 = vmatprep.subr.bf16.mxu1 %v800_v9 }
  0x1f   :  { %744 = vmatpush3.bf16.msra.mxu0 %v800_v9  ;;  %792 = vmatpush3.bf16.msra.mxu1 %v800_v9 }
  0x22   :  { %746 = vmatmul.mubr.bf16.vlgmr.msra.gmra.mxu0 %v803_v10  ;;  %762 = vmatmul.mubr.bf16.vlgmr.msra.gmra.mxu1 %v804_v11 }
  0x23   :  { %749 = vmatprep.mubr.bf16.mxu0 %v805_v12  ;;  %765 = vmatprep.mubr.bf16.mxu1 %v806_v13 }
  0x2a   :  { %750 = vmatmul.mubr.bf16.gmra.mxu0 %v807_v14  ;;  %766 = vmatmul.mubr.bf16.gmra.mxu1 %v808_v15 }
  0x2b   :  { %753 = vmatprep.mubr.bf16.mxu0 %v809_v16  ;;  %769 = vmatprep.mubr.bf16.mxu1 %v810_v17 }
  0x32   :  { %754 = vmatmul.mubr.bf16.gmra.mxu0 %v811_v18  ;;  %770 = vmatmul.mubr.bf16.gmra.mxu1 %v812_v19 }
  0x33   :  { %757 = vmatprep.mubr.bf16.mxu0 %v813_v20  ;;  %773 = vmatprep.mubr.bf16.mxu1 %v814_v21 }
  0x3a   :  { %758 = vmatmul.mubr.bf16.gmra.mxu0 %v815_v22  ;;  %774 = vmatmul.mubr.bf16.gmra.mxu1 %v816_v23 }
  0xe2   :  { %v747_v25 = vpop.f32.mrf.mxu0  ;;  %v763_v26 = vpop.f32.mrf.mxu1 }
  0xe3   :  { %v447_v27 = vadd.f32 %v747_v25, %v917_v24  ;;  %v463_v28 = vadd.f32 %v763_v26, %v917_v24 }
  0xe4   :  { %v318_v29 = vpop.f32.mrf.mxu0  ;;  %v382_v30 = vpop.f32.mrf.mxu1 }
  0xe5   :  { %479 = vst [vmem:[%s1146_s3 + $0x10] sm:$0xff] %v447_v27  ;;  %vm546_vm0 = vcmp.ge.f32.partialorder %v447_v27, 0.0  ;;  %v578_v31 = vmul.f32 0.2, %v447_v27  ;;  %495 = vst [vmem:[%s1146_s3 + $0x90] sm:$0xff] %v463_v28  ;;  %vm562_vm1 = vcmp.ge.f32.partialorder %v463_v28, 0.0  ;;  %v445_v33 = vadd.f32 %v917_v24, %v318_v29 }
  0xe6   :  { %v594_v32 = vmul.f32 0.2, %v463_v28  ;;  %v461_v34 = vadd.f32 %v917_v24, %v382_v30  ;;  %v748_v35 = vpop.f32.mrf.mxu0  ;;  %v764_v36 = vpop.f32.mrf.mxu1 }
  0xe7   :  { %v610_v37 = vsel %vm546_vm0, %v447_v27, %v578_v31  ;;  %v448_v39 = vadd.f32 %v748_v35, %v917_v24  ;;  %v464_v40 = vadd.f32 %v764_v36, %v917_v24  ;;  %477 = vst [vmem:[%s1146_s3] sm:$0xff] %v445_v33  ;;  %vm544_vm2 = vcmp.ge.f32.partialorder %v445_v33, 0.0 }
  0xe8   :  { %v626_v38 = vsel %vm562_vm1, %v463_v28, %v594_v32  ;;  %642 = vst [vmem:[%s1147_s4 + $0x10] sm:$0xff] %v610_v37  ;;  %v576_v41 = vmul.f32 0.2, %v445_v33  ;;  %493 = vst [vmem:[%s1146_s3 + $0x80] sm:$0xff] %v461_v34  ;;  %vm560_vm3 = vcmp.ge.f32.partialorder %v461_v34, 0.0  ;;  %v321_v43 = vpop.f32.mrf.mxu0  ;;  %v385_v44 = vpop.f32.mrf.mxu1 }
  0xe9   :  { %658 = vst [vmem:[%s1147_s4 + $0x90] sm:$0xff] %v626_v38  ;;  %v592_v42 = vmul.f32 0.2, %v461_v34  ;;  %480 = vst [vmem:[%s1146_s3 + $0x18] sm:$0xff] %v448_v39  ;;  %vm547_vm4 = vcmp.ge.f32.partialorder %v448_v39, 0.0  ;;  %vm563_vm5 = vcmp.ge.f32.partialorder %v464_v40, 0.0  ;;  %v446_v49 = vadd.f32 %v917_v24, %v321_v43 }
  0xea   :  { %v579_v45 = vmul.f32 0.2, %v448_v39  ;;  %496 = vst [vmem:[%s1146_s3 + $0x98] sm:$0xff] %v464_v40  ;;  %v595_v46 = vmul.f32 0.2, %v464_v40  ;;  %v608_v47 = vsel %vm544_vm2, %v445_v33, %v576_v41  ;;  %v462_v50 = vadd.f32 %v917_v24, %v385_v44  ;;  %v751_v51 = vpop.f32.mrf.mxu0  ;;  %v767_v52 = vpop.f32.mrf.mxu1 }
  0xeb   :  { %v624_v48 = vsel %vm560_vm3, %v461_v34, %v592_v42  ;;  %640 = vst [vmem:[%s1147_s4] sm:$0xff] %v608_v47  ;;  %v451_v55 = vadd.f32 %v751_v51, %v917_v24  ;;  %v467_v56 = vadd.f32 %v767_v52, %v917_v24  ;;  %478 = vst [vmem:[%s1146_s3 + $0x8] sm:$0xff] %v446_v49  ;;  %vm545_vm6 = vcmp.ge.f32.partialorder %v446_v49, 0.0 }
  0xec   :  { %656 = vst [vmem:[%s1147_s4 + $0x80] sm:$0xff] %v624_v48  ;;  %v611_v53 = vsel %vm547_vm4, %v448_v39, %v579_v45  ;;  %v627_v54 = vsel %vm563_vm5, %v464_v40, %v595_v46  ;;  %v577_v57 = vmul.f32 0.2, %v446_v49  ;;  %494 = vst [vmem:[%s1146_s3 + $0x88] sm:$0xff] %v462_v50  ;;  %vm561_vm7 = vcmp.ge.f32.partialorder %v462_v50, 0.0  ;;  %v334_v59 = vpop.f32.mrf.mxu0  ;;  %v398_v60 = vpop.f32.mrf.mxu1 }
  0xed   :  { %643 = vst [vmem:[%s1147_s4 + $0x18] sm:$0xff] %v611_v53  ;;  %659 = vst [vmem:[%s1147_s4 + $0x98] sm:$0xff] %v627_v54  ;;  %v593_v58 = vmul.f32 0.2, %v462_v50  ;;  %vm550_vm8 = vcmp.ge.f32.partialorder %v451_v55, 0.0  ;;  %vm566_vm9 = vcmp.ge.f32.partialorder %v467_v56, 0.0  ;;  %v449_v1 = vadd.f32 %v917_v24, %v334_v59 }
  0xee   :  { %483 = vst [vmem:[%s1146_s3 + $0x30] sm:$0xff] %v451_v55  ;;  %v582_v61 = vmul.f32 0.2, %v451_v55  ;;  %499 = vst [vmem:[%s1146_s3 + $0xb0] sm:$0xff] %v467_v56  ;;  %v598_v62 = vmul.f32 0.2, %v467_v56  ;;  %v609_v63 = vsel %vm545_vm6, %v446_v49, %v577_v57  ;;  %v465_v2 = vadd.f32 %v917_v24, %v398_v60  ;;  %v752_v3 = vpop.f32.mrf.mxu0  ;;  %v768_v4 = vpop.f32.mrf.mxu1 }
  0xef   :  { %v625_v0 = vsel %vm561_vm7, %v462_v50, %v593_v58  ;;  %641 = vst [vmem:[%s1147_s4 + $0x8] sm:$0xff] %v609_v63  ;;  %v452_v7 = vadd.f32 %v752_v3, %v917_v24  ;;  %v468_v8 = vadd.f32 %v768_v4, %v917_v24  ;;  %481 = vst [vmem:[%s1146_s3 + $0x20] sm:$0xff] %v449_v1  ;;  %vm548_vm10 = vcmp.ge.f32.partialorder %v449_v1, 0.0 }
  0xf0   :  { %657 = vst [vmem:[%s1147_s4 + $0x88] sm:$0xff] %v625_v0  ;;  %v614_v5 = vsel %vm550_vm8, %v451_v55, %v582_v61  ;;  %v630_v6 = vsel %vm566_vm9, %v467_v56, %v598_v62  ;;  %v580_v9 = vmul.f32 0.2, %v449_v1  ;;  %497 = vst [vmem:[%s1146_s3 + $0xa0] sm:$0xff] %v465_v2  ;;  %vm564_vm11 = vcmp.ge.f32.partialorder %v465_v2, 0.0  ;;  %v337_v11 = vpop.f32.mrf.mxu0  ;;  %v401_v12 = vpop.f32.mrf.mxu1 }
  0xf1   :  { %646 = vst [vmem:[%s1147_s4 + $0x30] sm:$0xff] %v614_v5  ;;  %662 = vst [vmem:[%s1147_s4 + $0xb0] sm:$0xff] %v630_v6  ;;  %v596_v10 = vmul.f32 0.2, %v465_v2  ;;  %vm551_vm12 = vcmp.ge.f32.partialorder %v452_v7, 0.0  ;;  %vm567_vm13 = vcmp.ge.f32.partialorder %v468_v8, 0.0  ;;  %v450_v17 = vadd.f32 %v917_v24, %v337_v11 }
  0xf2   :  { %484 = vst [vmem:[%s1146_s3 + $0x38] sm:$0xff] %v452_v7  ;;  %v583_v13 = vmul.f32 0.2, %v452_v7  ;;  %500 = vst [vmem:[%s1146_s3 + $0xb8] sm:$0xff] %v468_v8  ;;  %v599_v14 = vmul.f32 0.2, %v468_v8  ;;  %v612_v15 = vsel %vm548_vm10, %v449_v1, %v580_v9  ;;  %v466_v18 = vadd.f32 %v917_v24, %v401_v12  ;;  %v755_v19 = vpop.f32.mrf.mxu0  ;;  %v771_v20 = vpop.f32.mrf.mxu1 }
  0xf3   :  { %v628_v16 = vsel %vm564_vm11, %v465_v2, %v596_v10  ;;  %644 = vst [vmem:[%s1147_s4 + $0x20] sm:$0xff] %v612_v15  ;;  %v455_v23 = vadd.f32 %v755_v19, %v917_v24  ;;  %v471_v25 = vadd.f32 %v771_v20, %v917_v24  ;;  %482 = vst [vmem:[%s1146_s3 + $0x28] sm:$0xff] %v450_v17  ;;  %vm549_vm14 = vcmp.ge.f32.partialorder %v450_v17, 0.0 }
  0xf4   :  { %660 = vst [vmem:[%s1147_s4 + $0xa0] sm:$0xff] %v628_v16  ;;  %v615_v21 = vsel %vm551_vm12, %v452_v7, %v583_v13  ;;  %v631_v22 = vsel %vm567_vm13, %v468_v8, %v599_v14  ;;  %v581_v26 = vmul.f32 0.2, %v450_v17  ;;  %498 = vst [vmem:[%s1146_s3 + $0xa8] sm:$0xff] %v466_v18  ;;  %vm565_vm15 = vcmp.ge.f32.partialorder %v466_v18, 0.0  ;;  %v350_v28 = vpop.f32.mrf.mxu0  ;;  %v414_v29 = vpop.f32.mrf.mxu1 }
  0xf5   :  { %647 = vst [vmem:[%s1147_s4 + $0x38] sm:$0xff] %v615_v21  ;;  %663 = vst [vmem:[%s1147_s4 + $0xb8] sm:$0xff] %v631_v22  ;;  %v597_v27 = vmul.f32 0.2, %v466_v18  ;;  %vm554_vm0 = vcmp.ge.f32.partialorder %v455_v23, 0.0  ;;  %vm570_vm1 = vcmp.ge.f32.partialorder %v471_v25, 0.0  ;;  %v453_v34 = vadd.f32 %v917_v24, %v350_v28 }
  0xf6   :  { %487 = vst [vmem:[%s1146_s3 + $0x50] sm:$0xff] %v455_v23  ;;  %v586_v30 = vmul.f32 0.2, %v455_v23  ;;  %503 = vst [vmem:[%s1146_s3 + $0xd0] sm:$0xff] %v471_v25  ;;  %v602_v31 = vmul.f32 0.2, %v471_v25  ;;  %v613_v32 = vsel %vm549_vm14, %v450_v17, %v581_v26  ;;  %v469_v35 = vadd.f32 %v917_v24, %v414_v29  ;;  %v756_v36 = vpop.f32.mrf.mxu0  ;;  %v772_v37 = vpop.f32.mrf.mxu1 }
  0xf7   :  { %v629_v33 = vsel %vm565_vm15, %v466_v18, %v597_v27  ;;  %645 = vst [vmem:[%s1147_s4 + $0x28] sm:$0xff] %v613_v32  ;;  %v456_v40 = vadd.f32 %v756_v36, %v917_v24  ;;  %v472_v41 = vadd.f32 %v772_v37, %v917_v24  ;;  %485 = vst [vmem:[%s1146_s3 + $0x40] sm:$0xff] %v453_v34  ;;  %vm552_vm2 = vcmp.ge.f32.partialorder %v453_v34, 0.0 }
  0xf8   :  { %661 = vst [vmem:[%s1147_s4 + $0xa8] sm:$0xff] %v629_v33  ;;  %v618_v38 = vsel %vm554_vm0, %v455_v23, %v586_v30  ;;  %v634_v39 = vsel %vm570_vm1, %v471_v25, %v602_v31  ;;  %v584_v42 = vmul.f32 0.2, %v453_v34  ;;  %501 = vst [vmem:[%s1146_s3 + $0xc0] sm:$0xff] %v469_v35  ;;  %vm568_vm3 = vcmp.ge.f32.partialorder %v469_v35, 0.0  ;;  %v353_v44 = vpop.f32.mrf.mxu0  ;;  %v417_v45 = vpop.f32.mrf.mxu1 }
  0xf9   :  { %650 = vst [vmem:[%s1147_s4 + $0x50] sm:$0xff] %v618_v38  ;;  %666 = vst [vmem:[%s1147_s4 + $0xd0] sm:$0xff] %v634_v39  ;;  %v600_v43 = vmul.f32 0.2, %v469_v35  ;;  %vm555_vm4 = vcmp.ge.f32.partialorder %v456_v40, 0.0  ;;  %vm571_vm5 = vcmp.ge.f32.partialorder %v472_v41, 0.0  ;;  %v454_v50 = vadd.f32 %v917_v24, %v353_v44 }
  0xfa   :  { %488 = vst [vmem:[%s1146_s3 + $0x58] sm:$0xff] %v456_v40  ;;  %v587_v46 = vmul.f32 0.2, %v456_v40  ;;  %504 = vst [vmem:[%s1146_s3 + $0xd8] sm:$0xff] %v472_v41  ;;  %v603_v47 = vmul.f32 0.2, %v472_v41  ;;  %v616_v48 = vsel %vm552_vm2, %v453_v34, %v584_v42  ;;  %v470_v51 = vadd.f32 %v917_v24, %v417_v45  ;;  %v759_v52 = vpop.f32.mrf.mxu0  ;;  %v775_v53 = vpop.f32.mrf.mxu1 }
  0xfb   :  { %v632_v49 = vsel %vm568_vm3, %v469_v35, %v600_v43  ;;  %648 = vst [vmem:[%s1147_s4 + $0x40] sm:$0xff] %v616_v48  ;;  %v459_v56 = vadd.f32 %v759_v52, %v917_v24  ;;  %v475_v57 = vadd.f32 %v775_v53, %v917_v24  ;;  %486 = vst [vmem:[%s1146_s3 + $0x48] sm:$0xff] %v454_v50  ;;  %vm553_vm6 = vcmp.ge.f32.partialorder %v454_v50, 0.0 }
  0xfc   :  { %664 = vst [vmem:[%s1147_s4 + $0xc0] sm:$0xff] %v632_v49  ;;  %v619_v54 = vsel %vm555_vm4, %v456_v40, %v587_v46  ;;  %v635_v55 = vsel %vm571_vm5, %v472_v41, %v603_v47  ;;  %v585_v58 = vmul.f32 0.2, %v454_v50  ;;  %502 = vst [vmem:[%s1146_s3 + $0xc8] sm:$0xff] %v470_v51  ;;  %vm569_vm7 = vcmp.ge.f32.partialorder %v470_v51, 0.0  ;;  %v366_v60 = vpop.f32.mrf.mxu0  ;;  %v430_v61 = vpop.f32.mrf.mxu1 }
  0xfd   :  { %651 = vst [vmem:[%s1147_s4 + $0x58] sm:$0xff] %v619_v54  ;;  %667 = vst [vmem:[%s1147_s4 + $0xd8] sm:$0xff] %v635_v55  ;;  %v601_v59 = vmul.f32 0.2, %v470_v51  ;;  %vm558_vm8 = vcmp.ge.f32.partialorder %v459_v56, 0.0  ;;  %vm574_vm9 = vcmp.ge.f32.partialorder %v475_v57, 0.0  ;;  %v457_v2 = vadd.f32 %v917_v24, %v366_v60 }
  0xfe   :  { %491 = vst [vmem:[%s1146_s3 + $0x70] sm:$0xff] %v459_v56  ;;  %v590_v62 = vmul.f32 0.2, %v459_v56  ;;  %507 = vst [vmem:[%s1146_s3 + $0xf0] sm:$0xff] %v475_v57  ;;  %v606_v63 = vmul.f32 0.2, %v475_v57  ;;  %v617_v0 = vsel %vm553_vm6, %v454_v50, %v585_v58  ;;  %v473_v3 = vadd.f32 %v917_v24, %v430_v61  ;;  %v760_v4 = vpop.f32.mrf.mxu0  ;;  %v776_v5 = vpop.f32.mrf.mxu1 }
  0xff   :  { %v633_v1 = vsel %vm569_vm7, %v470_v51, %v601_v59  ;;  %649 = vst [vmem:[%s1147_s4 + $0x48] sm:$0xff] %v617_v0  ;;  %v460_v8 = vadd.f32 %v760_v4, %v917_v24  ;;  %v476_v9 = vadd.f32 %v776_v5, %v917_v24  ;;  %489 = vst [vmem:[%s1146_s3 + $0x60] sm:$0xff] %v457_v2  ;;  %vm556_vm10 = vcmp.ge.f32.partialorder %v457_v2, 0.0 }
 0x100   :  { %665 = vst [vmem:[%s1147_s4 + $0xc8] sm:$0xff] %v633_v1  ;;  %v622_v6 = vsel %vm558_vm8, %v459_v56, %v590_v62  ;;  %v638_v7 = vsel %vm574_vm9, %v475_v57, %v606_v63  ;;  %v588_v10 = vmul.f32 0.2, %v457_v2  ;;  %505 = vst [vmem:[%s1146_s3 + $0xe0] sm:$0xff] %v473_v3  ;;  %vm572_vm11 = vcmp.ge.f32.partialorder %v473_v3, 0.0  ;;  %v369_v12 = vpop.f32.mrf.mxu0  ;;  %v433_v13 = vpop.f32.mrf.mxu1 }
 0x101   :  { %654 = vst [vmem:[%s1147_s4 + $0x70] sm:$0xff] %v622_v6  ;;  %670 = vst [vmem:[%s1147_s4 + $0xf0] sm:$0xff] %v638_v7  ;;  %v604_v11 = vmul.f32 0.2, %v473_v3  ;;  %vm559_vm12 = vcmp.ge.f32.partialorder %v460_v8, 0.0  ;;  %vm575_vm13 = vcmp.ge.f32.partialorder %v476_v9, 0.0  ;;  %v458_v18 = vadd.f32 %v917_v24, %v369_v12 }
 0x102   :  { %492 = vst [vmem:[%s1146_s3 + $0x78] sm:$0xff] %v460_v8  ;;  %v591_v14 = vmul.f32 0.2, %v460_v8  ;;  %508 = vst [vmem:[%s1146_s3 + $0xf8] sm:$0xff] %v476_v9  ;;  %v607_v15 = vmul.f32 0.2, %v476_v9  ;;  %v620_v16 = vsel %vm556_vm10, %v457_v2, %v588_v10  ;;  %v474_v19 = vadd.f32 %v917_v24, %v433_v13 }
 0x103   :  { %v636_v17 = vsel %vm572_vm11, %v473_v3, %v604_v11  ;;  %652 = vst [vmem:[%s1147_s4 + $0x60] sm:$0xff] %v620_v16  ;;  %490 = vst [vmem:[%s1146_s3 + $0x68] sm:$0xff] %v458_v18  ;;  %vm557_vm14 = vcmp.ge.f32.partialorder %v458_v18, 0.0  ;;  %v589_v24 = vmul.f32 0.2, %v458_v18 }
 0x104   :  { %668 = vst [vmem:[%s1147_s4 + $0xe0] sm:$0xff] %v636_v17  ;;  %v623_v20 = vsel %vm559_vm12, %v460_v8, %v591_v14  ;;  %v639_v21 = vsel %vm575_vm13, %v476_v9, %v607_v15  ;;  %506 = vst [vmem:[%s1146_s3 + $0xe8] sm:$0xff] %v474_v19  ;;  %vm573_vm15 = vcmp.ge.f32.partialorder %v474_v19, 0.0  ;;  %v605_v22 = vmul.f32 0.2, %v474_v19 }
 0x105   :  { %655 = vst [vmem:[%s1147_s4 + $0x78] sm:$0xff] %v623_v20  ;;  %671 = vst [vmem:[%s1147_s4 + $0xf8] sm:$0xff] %v639_v21  ;;  %v621_v23 = vsel %vm557_vm14, %v458_v18, %v589_v24 }
 0x106   :  { %v637_v25 = vsel %vm573_vm15, %v474_v19, %v605_v22  ;;  %653 = vst [vmem:[%s1147_s4 + $0x68] sm:$0xff] %v621_v23 }
 0x107   :  { %669 = vst [vmem:[%s1147_s4 + $0xe8] sm:$0xff] %v637_v25 }

// kernel: multiscale_forward.7
= control target key start
LH: loop header
LB: loop body
LE: loop exit
PB: predicated region body
PF: predicated region fallthrough
CT: control target
= control target key end

     0   :  { %v715_v0 = vmov 0.0   ;;  %vm716_vm0 = vmmov 0   ;;  %s1027_s1 = inlined_call_operand.vmem [shape: bf16[128,128], index: 1, kind: input, shape index: {}]   ;;  %s1028_s0 = inlined_call_operand.vmem [shape: bf16[200,128], index: 0, kind: input, shape index: {}]   ;;  %s1029_s2 = inlined_call_operand.vmem [shape: f32[1,128], index: 2, kind: input, shape index: {}]   ;;  %s1030_s3 = inlined_call_operand.vmem [shape: f32[200,128], index: 3, kind: output, shape index: {0}]   ;;  %s1031_s4 = inlined_call_operand.vmem [shape: f32[200,128], index: 4, kind: output, shape index: {1}]  }
   0x1   :  { %608 = vmatprep.subr.bf16.mxu0 %v715_v0  ;;  %v694_v1 = vld [vmem:[%s1027_s1 + $0x38] sm:$0xff]   ;;  %676 = vmatprep.subr.bf16.mxu1 %v715_v0  ;;  %v695_v2 = vld [vmem:[%s1027_s1 + $0x30] sm:$0xff]   ;;  %v696_v3 = vld [vmem:[%s1027_s1 + $0x28] sm:$0xff]  }
   0x2   :  { %624 = vmatprep.mubr.msk.bf16.mxu0 %vm716_vm0, %v715_v0  ;;  %652 = vmatprep.mubr.msk.bf16.mxu1 %vm716_vm0, %v715_v0  ;;  %v697_v4 = vld [vmem:[%s1027_s1 + $0x20] sm:$0xff]   ;;  %v698_v5 = vld [vmem:[%s1027_s1 + $0x18] sm:$0xff]   ;;  %v699_v6 = vld [vmem:[%s1027_s1 + $0x10] sm:$0xff]  }
   0x3   :  { %609 = vmatpush3.bf16.msra.mxu0 %v694_v1  ;;  %684 = vmatpush3.bf16.msra.mxu1 %v694_v1  ;;  %v700_v7 = vld [vmem:[%s1027_s1 + $0x8] sm:$0xff]   ;;  %v701_v8 = vld [vmem:[%s1027_s1] sm:$0xff]   ;;  %v703_v10 = vld [vmem:[%s1028_s0 + $0x38] sm:$0xff]  }
   0x4   :  { %610 = vmatprep.subr.bf16.mxu0 %v715_v0  ;;  %677 = vmatprep.subr.bf16.mxu1 %v715_v0  ;;  %v702_v9 = vld [vmem:[%s1028_s0] sm:$0xff]   ;;  %v704_v11 = vld [vmem:[%s1028_s0 + $0x8] sm:$0xff]   ;;  %v706_v13 = vld [vmem:[%s1028_s0 + $0x10] sm:$0xff]  }
   0x5   :  { %v705_v12 = vld [vmem:[%s1028_s0 + $0x40] sm:$0xff]   ;;  %v707_v14 = vld [vmem:[%s1028_s0 + $0x48] sm:$0xff]   ;;  %v708_v15 = vld [vmem:[%s1028_s0 + $0x18] sm:$0xff]  }
   0x6   :  { %v709_v16 = vld [vmem:[%s1028_s0 + $0x50] sm:$0xff]   ;;  %v710_v17 = vld [vmem:[%s1028_s0 + $0x20] sm:$0xff]   ;;  %v711_v18 = vld [vmem:[%s1028_s0 + $0x58] sm:$0xff]  }
   0x7   :  { %611 = vmatpush3.bf16.msra.mxu0 %v695_v2  ;;  %685 = vmatpush3.bf16.msra.mxu1 %v695_v2  ;;  %v712_v19 = vld [vmem:[%s1028_s0 + $0x28] sm:$0xff]   ;;  %v713_v20 = vld [vmem:[%s1028_s0 + $0x60] ss:$0 sps:$4 sm:$0xff]   ;;  %v714_v21 = vld [vmem:[%s1028_s0 + $0x30] sm:$0xff]  }
   0x8   :  { %612 = vmatprep.subr.bf16.mxu0 %v715_v0  ;;  %678 = vmatprep.subr.bf16.mxu1 %v715_v0  ;;  %v850_v22 = vld [vmem:[%s1029_s2] ss:$0 sm:$0xff] }
   0xb   :  { %613 = vmatpush3.bf16.msra.mxu0 %v696_v3  ;;  %686 = vmatpush3.bf16.msra.mxu1 %v696_v3 }
   0xc   :  { %614 = vmatprep.subr.bf16.mxu0 %v715_v0  ;;  %679 = vmatprep.subr.bf16.mxu1 %v715_v0 }
   0xf   :  { %615 = vmatpush3.bf16.msra.mxu0 %v697_v4  ;;  %687 = vmatpush3.bf16.msra.mxu1 %v697_v4 }
  0x10   :  { %616 = vmatprep.subr.bf16.mxu0 %v715_v0  ;;  %680 = vmatprep.subr.bf16.mxu1 %v715_v0 }
  0x13   :  { %617 = vmatpush3.bf16.msra.mxu0 %v698_v5  ;;  %688 = vmatpush3.bf16.msra.mxu1 %v698_v5 }
  0x14   :  { %618 = vmatprep.subr.bf16.mxu0 %v715_v0  ;;  %681 = vmatprep.subr.bf16.mxu1 %v715_v0 }
  0x17   :  { %619 = vmatpush3.bf16.msra.mxu0 %v699_v6  ;;  %689 = vmatpush3.bf16.msra.mxu1 %v699_v6 }
  0x18   :  { %620 = vmatprep.subr.bf16.mxu0 %v715_v0  ;;  %682 = vmatprep.subr.bf16.mxu1 %v715_v0 }
  0x1b   :  { %621 = vmatpush3.bf16.msra.mxu0 %v700_v7  ;;  %690 = vmatpush3.bf16.msra.mxu1 %v700_v7 }
  0x1c   :  { %622 = vmatprep.subr.bf16.mxu0 %v715_v0  ;;  %683 = vmatprep.subr.bf16.mxu1 %v715_v0 }
  0x1f   :  { %623 = vmatpush3.bf16.msra.mxu0 %v701_v8  ;;  %691 = vmatpush3.bf16.msra.mxu1 %v701_v8 }
  0x22   :  { %625 = vmatmul.mubr.bf16.vlgmr.msra.gmra.mxu0 %v702_v9  ;;  %653 = vmatmul.mubr.bf16.vlgmr.msra.gmra.mxu1 %v703_v10 }
  0x23   :  { %628 = vmatprep.mubr.msk.bf16.mxu0 %vm716_vm0, %v715_v0  ;;  %656 = vmatprep.mubr.msk.bf16.mxu1 %vm716_vm0, %v715_v0 }
  0x2a   :  { %629 = vmatmul.mubr.bf16.gmra.mxu0 %v704_v11  ;;  %657 = vmatmul.mubr.bf16.gmra.mxu1 %v705_v12 }
  0x2b   :  { %632 = vmatprep.mubr.msk.bf16.mxu0 %vm716_vm0, %v715_v0  ;;  %660 = vmatprep.mubr.msk.bf16.mxu1 %vm716_vm0, %v715_v0 }
  0x32   :  { %633 = vmatmul.mubr.bf16.gmra.mxu0 %v706_v13  ;;  %661 = vmatmul.mubr.bf16.gmra.mxu1 %v707_v14 }
  0x33   :  { %636 = vmatprep.mubr.msk.bf16.mxu0 %vm716_vm0, %v715_v0  ;;  %664 = vmatprep.mubr.msk.bf16.mxu1 %vm716_vm0, %v715_v0 }
  0x3a   :  { %637 = vmatmul.mubr.bf16.gmra.mxu0 %v708_v15  ;;  %665 = vmatmul.mubr.bf16.gmra.mxu1 %v709_v16 }
  0x3b   :  { %640 = vmatprep.mubr.msk.bf16.mxu0 %vm716_vm0, %v715_v0  ;;  %668 = vmatprep.mubr.msk.bf16.mxu1 %vm716_vm0, %v715_v0 }
  0x42   :  { %641 = vmatmul.mubr.bf16.gmra.mxu0 %v710_v17  ;;  %669 = vmatmul.mubr.bf16.gmra.mxu1 %v711_v18 }
  0x43   :  { %644 = vmatprep.mubr.msk.bf16.mxu0 %vm716_vm0, %v715_v0  ;;  %672 = vmatprep.mubr.msk.bf16.mxu1 %vm716_vm0, %v715_v0 }
  0x4a   :  { %645 = vmatmul.mubr.bf16.gmra.mxu0 %v712_v19  ;;  %673 = vmatmul.mubr.bf16.gmra.mxu1 %v713_v20 }
  0x4b   :  { %648 = vmatprep.mubr.msk.bf16.mxu0 %vm716_vm0, %v715_v0 }
  0x52   :  { %649 = vmatmul.mubr.bf16.gmra.mxu0 %v714_v21 }
  0xe2   :  { %v277_v23 = vpop.f32.mrf.mxu0  ;;  %v333_v24 = vpop.f32.mrf.mxu1 }
  0xe3   :  { %v379_v25 = vadd.f32 %v850_v22, %v277_v23  ;;  %v393_v26 = vadd.f32 %v850_v22, %v333_v24 }
  0xe4   :  { %v626_v27 = vpop.f32.mrf.mxu0  ;;  %v654_v28 = vpop.f32.mrf.mxu1 }
  0xe5   :  { %404 = vst [vmem:[%s1030_s3] sm:$0xff] %v379_v25  ;;  %vm457_vm1 = vcmp.ge.f32.partialorder %v379_v25, 0.0  ;;  %v482_v29 = vmul.f32 0.2, %v379_v25  ;;  %418 = vst [vmem:[%s1030_s3 + $0x70] sm:$0xff] %v393_v26  ;;  %vm471_vm2 = vcmp.ge.f32.partialorder %v393_v26, 0.0 }
  0xe6   :  { %v496_v30 = vmul.f32 0.2, %v393_v26  ;;  %v280_v31 = vpop.f32.mrf.mxu0  ;;  %v336_v32 = vpop.f32.mrf.mxu1 }
  0xe7   :  { %v507_v33 = vsel %vm457_vm1, %v379_v25, %v482_v29  ;;  %v380_v34 = vadd.f32 %v850_v22, %v280_v31  ;;  %v394_v36 = vadd.f32 %v850_v22, %v336_v32 }
  0xe8   :  { %v521_v35 = vsel %vm471_vm2, %v393_v26, %v496_v30  ;;  %532 = vst [vmem:[%s1031_s4] sm:$0xff] %v507_v33  ;;  %v627_v37 = vpop.f32.mrf.mxu0  ;;  %v655_v38 = vpop.f32.mrf.mxu1 }
  0xe9   :  { %546 = vst [vmem:[%s1031_s4 + $0x70] sm:$0xff] %v521_v35  ;;  %405 = vst [vmem:[%s1030_s3 + $0x8] sm:$0xff] %v380_v34  ;;  %vm458_vm3 = vcmp.ge.f32.partialorder %v380_v34, 0.0  ;;  %v483_v39 = vmul.f32 0.2, %v380_v34  ;;  %vm472_vm4 = vcmp.ge.f32.partialorder %v394_v36, 0.0 }
  0xea   :  { %419 = vst [vmem:[%s1030_s3 + $0x78] sm:$0xff] %v394_v36  ;;  %v497_v40 = vmul.f32 0.2, %v394_v36  ;;  %v285_v41 = vpop.f32.mrf.mxu0  ;;  %v341_v42 = vpop.f32.mrf.mxu1 }
  0xeb   :  { %v508_v43 = vsel %vm458_vm3, %v380_v34, %v483_v39  ;;  %v381_v44 = vadd.f32 %v850_v22, %v285_v41  ;;  %v395_v46 = vadd.f32 %v850_v22, %v341_v42 }
  0xec   :  { %v522_v45 = vsel %vm472_vm4, %v394_v36, %v497_v40  ;;  %533 = vst [vmem:[%s1031_s4 + $0x8] sm:$0xff] %v508_v43  ;;  %v630_v47 = vpop.f32.mrf.mxu0  ;;  %v658_v48 = vpop.f32.mrf.mxu1 }
  0xed   :  { %547 = vst [vmem:[%s1031_s4 + $0x78] sm:$0xff] %v522_v45  ;;  %406 = vst [vmem:[%s1030_s3 + $0x10] sm:$0xff] %v381_v44  ;;  %vm459_vm5 = vcmp.ge.f32.partialorder %v381_v44, 0.0  ;;  %v484_v49 = vmul.f32 0.2, %v381_v44  ;;  %vm473_vm6 = vcmp.ge.f32.partialorder %v395_v46, 0.0 }
  0xee   :  { %420 = vst [vmem:[%s1030_s3 + $0x80] sm:$0xff] %v395_v46  ;;  %v498_v50 = vmul.f32 0.2, %v395_v46  ;;  %v288_v51 = vpop.f32.mrf.mxu0  ;;  %v344_v52 = vpop.f32.mrf.mxu1 }
  0xef   :  { %v509_v53 = vsel %vm459_vm5, %v381_v44, %v484_v49  ;;  %v382_v54 = vadd.f32 %v850_v22, %v288_v51  ;;  %v396_v56 = vadd.f32 %v850_v22, %v344_v52 }
  0xf0   :  { %v523_v55 = vsel %vm473_vm6, %v395_v46, %v498_v50  ;;  %534 = vst [vmem:[%s1031_s4 + $0x10] sm:$0xff] %v509_v53  ;;  %v631_v57 = vpop.f32.mrf.mxu0  ;;  %v659_v58 = vpop.f32.mrf.mxu1 }
  0xf1   :  { %548 = vst [vmem:[%s1031_s4 + $0x80] sm:$0xff] %v523_v55  ;;  %407 = vst [vmem:[%s1030_s3 + $0x18] sm:$0xff] %v382_v54  ;;  %vm460_vm7 = vcmp.ge.f32.partialorder %v382_v54, 0.0  ;;  %v485_v59 = vmul.f32 0.2, %v382_v54  ;;  %vm474_vm8 = vcmp.ge.f32.partialorder %v396_v56, 0.0 }
  0xf2   :  { %421 = vst [vmem:[%s1030_s3 + $0x88] sm:$0xff] %v396_v56  ;;  %v499_v60 = vmul.f32 0.2, %v396_v56  ;;  %v293_v61 = vpop.f32.mrf.mxu0  ;;  %v349_v62 = vpop.f32.mrf.mxu1 }
  0xf3   :  { %v510_v63 = vsel %vm460_vm7, %v382_v54, %v485_v59  ;;  %v383_v0 = vadd.f32 %v850_v22, %v293_v61  ;;  %v397_v2 = vadd.f32 %v850_v22, %v349_v62 }
  0xf4   :  { %v524_v1 = vsel %vm474_vm8, %v396_v56, %v499_v60  ;;  %535 = vst [vmem:[%s1031_s4 + $0x18] sm:$0xff] %v510_v63  ;;  %v634_v3 = vpop.f32.mrf.mxu0  ;;  %v662_v4 = vpop.f32.mrf.mxu1 }
  0xf5   :  { %549 = vst [vmem:[%s1031_s4 + $0x88] sm:$0xff] %v524_v1  ;;  %408 = vst [vmem:[%s1030_s3 + $0x20] sm:$0xff] %v383_v0  ;;  %vm461_vm9 = vcmp.ge.f32.partialorder %v383_v0, 0.0  ;;  %v486_v5 = vmul.f32 0.2, %v383_v0  ;;  %vm475_vm10 = vcmp.ge.f32.partialorder %v397_v2, 0.0 }
  0xf6   :  { %422 = vst [vmem:[%s1030_s3 + $0x90] sm:$0xff] %v397_v2  ;;  %v500_v6 = vmul.f32 0.2, %v397_v2  ;;  %v296_v7 = vpop.f32.mrf.mxu0  ;;  %v352_v8 = vpop.f32.mrf.mxu1 }
  0xf7   :  { %v511_v9 = vsel %vm461_vm9, %v383_v0, %v486_v5  ;;  %v384_v10 = vadd.f32 %v850_v22, %v296_v7  ;;  %v398_v12 = vadd.f32 %v850_v22, %v352_v8 }
  0xf8   :  { %v525_v11 = vsel %vm475_vm10, %v397_v2, %v500_v6  ;;  %536 = vst [vmem:[%s1031_s4 + $0x20] sm:$0xff] %v511_v9  ;;  %v635_v13 = vpop.f32.mrf.mxu0  ;;  %v663_v14 = vpop.f32.mrf.mxu1 }
  0xf9   :  { %550 = vst [vmem:[%s1031_s4 + $0x90] sm:$0xff] %v525_v11  ;;  %409 = vst [vmem:[%s1030_s3 + $0x28] sm:$0xff] %v384_v10  ;;  %vm462_vm11 = vcmp.ge.f32.partialorder %v384_v10, 0.0  ;;  %v487_v15 = vmul.f32 0.2, %v384_v10  ;;  %vm476_vm12 = vcmp.ge.f32.partialorder %v398_v12, 0.0 }
  0xfa   :  { %423 = vst [vmem:[%s1030_s3 + $0x98] sm:$0xff] %v398_v12  ;;  %v501_v16 = vmul.f32 0.2, %v398_v12  ;;  %v301_v17 = vpop.f32.mrf.mxu0  ;;  %v357_v18 = vpop.f32.mrf.mxu1 }
  0xfb   :  { %v512_v19 = vsel %vm462_vm11, %v384_v10, %v487_v15  ;;  %v385_v20 = vadd.f32 %v850_v22, %v301_v17  ;;  %v399_v23 = vadd.f32 %v850_v22, %v357_v18 }
  0xfc   :  { %v526_v21 = vsel %vm476_vm12, %v398_v12, %v501_v16  ;;  %537 = vst [vmem:[%s1031_s4 + $0x28] sm:$0xff] %v512_v19  ;;  %v638_v24 = vpop.f32.mrf.mxu0  ;;  %v666_v25 = vpop.f32.mrf.mxu1 }
  0xfd   :  { %551 = vst [vmem:[%s1031_s4 + $0x98] sm:$0xff] %v526_v21  ;;  %410 = vst [vmem:[%s1030_s3 + $0x30] sm:$0xff] %v385_v20  ;;  %vm463_vm13 = vcmp.ge.f32.partialorder %v385_v20, 0.0  ;;  %v488_v26 = vmul.f32 0.2, %v385_v20  ;;  %vm477_vm14 = vcmp.ge.f32.partialorder %v399_v23, 0.0 }
  0xfe   :  { %424 = vst [vmem:[%s1030_s3 + $0xa0] sm:$0xff] %v399_v23  ;;  %v502_v27 = vmul.f32 0.2, %v399_v23  ;;  %v304_v28 = vpop.f32.mrf.mxu0  ;;  %v360_v29 = vpop.f32.mrf.mxu1 }
  0xff   :  { %v513_v30 = vsel %vm463_vm13, %v385_v20, %v488_v26  ;;  %v386_v31 = vadd.f32 %v850_v22, %v304_v28  ;;  %v400_v33 = vadd.f32 %v850_v22, %v360_v29 }
 0x100   :  { %v527_v32 = vsel %vm477_vm14, %v399_v23, %v502_v27  ;;  %538 = vst [vmem:[%s1031_s4 + $0x30] sm:$0xff] %v513_v30  ;;  %v639_v34 = vpop.f32.mrf.mxu0  ;;  %v667_v35 = vpop.f32.mrf.mxu1 }
 0x101   :  { %552 = vst [vmem:[%s1031_s4 + $0xa0] sm:$0xff] %v527_v32  ;;  %411 = vst [vmem:[%s1030_s3 + $0x38] sm:$0xff] %v386_v31  ;;  %vm464_vm15 = vcmp.ge.f32.partialorder %v386_v31, 0.0  ;;  %v489_v36 = vmul.f32 0.2, %v386_v31  ;;  %vm478_vm0 = vcmp.ge.f32.partialorder %v400_v33, 0.0 }
 0x102   :  { %425 = vst [vmem:[%s1030_s3 + $0xa8] sm:$0xff] %v400_v33  ;;  %v503_v37 = vmul.f32 0.2, %v400_v33  ;;  %v309_v38 = vpop.f32.mrf.mxu0  ;;  %v365_v39 = vpop.f32.mrf.mxu1 }
 0x103   :  { %v514_v40 = vsel %vm464_vm15, %v386_v31, %v489_v36  ;;  %v387_v41 = vadd.f32 %v850_v22, %v309_v38  ;;  %v401_v43 = vadd.f32 %v850_v22, %v365_v39 }
 0x104   :  { %v528_v42 = vsel %vm478_vm0, %v400_v33, %v503_v37  ;;  %539 = vst [vmem:[%s1031_s4 + $0x38] sm:$0xff] %v514_v40  ;;  %v642_v44 = vpop.f32.mrf.mxu0  ;;  %v670_v45 = vpop.f32.mrf.mxu1 }
 0x105   :  { %553 = vst [vmem:[%s1031_s4 + $0xa8] sm:$0xff] %v528_v42  ;;  %412 = vst [vmem:[%s1030_s3 + $0x40] sm:$0xff] %v387_v41  ;;  %vm465_vm1 = vcmp.ge.f32.partialorder %v387_v41, 0.0  ;;  %v490_v46 = vmul.f32 0.2, %v387_v41  ;;  %vm479_vm2 = vcmp.ge.f32.partialorder %v401_v43, 0.0 }
 0x106   :  { %426 = vst [vmem:[%s1030_s3 + $0xb0] sm:$0xff] %v401_v43  ;;  %v504_v47 = vmul.f32 0.2, %v401_v43  ;;  %v312_v48 = vpop.f32.mrf.mxu0  ;;  %v368_v49 = vpop.f32.mrf.mxu1 }
 0x107   :  { %v515_v50 = vsel %vm465_vm1, %v387_v41, %v490_v46  ;;  %v388_v51 = vadd.f32 %v850_v22, %v312_v48  ;;  %v402_v53 = vadd.f32 %v850_v22, %v368_v49 }
 0x108   :  { %v529_v52 = vsel %vm479_vm2, %v401_v43, %v504_v47  ;;  %540 = vst [vmem:[%s1031_s4 + $0x40] sm:$0xff] %v515_v50  ;;  %v643_v54 = vpop.f32.mrf.mxu0  ;;  %v671_v55 = vpop.f32.mrf.mxu1 }
 0x109   :  { %554 = vst [vmem:[%s1031_s4 + $0xb0] sm:$0xff] %v529_v52  ;;  %413 = vst [vmem:[%s1030_s3 + $0x48] sm:$0xff] %v388_v51  ;;  %vm466_vm3 = vcmp.ge.f32.partialorder %v388_v51, 0.0  ;;  %v491_v56 = vmul.f32 0.2, %v388_v51  ;;  %vm480_vm4 = vcmp.ge.f32.partialorder %v402_v53, 0.0 }
 0x10a   :  { %427 = vst [vmem:[%s1030_s3 + $0xb8] sm:$0xff] %v402_v53  ;;  %v505_v57 = vmul.f32 0.2, %v402_v53  ;;  %v317_v58 = vpop.f32.mrf.mxu0  ;;  %v373_v59 = vpop.f32.mrf.mxu1 }
 0x10b   :  { %v516_v60 = vsel %vm466_vm3, %v388_v51, %v491_v56  ;;  %v389_v61 = vadd.f32 %v850_v22, %v317_v58  ;;  %v403_v63 = vadd.f32 %v850_v22, %v373_v59 }
 0x10c   :  { %v530_v62 = vsel %vm480_vm4, %v402_v53, %v505_v57  ;;  %541 = vst [vmem:[%s1031_s4 + $0x48] sm:$0xff] %v516_v60  ;;  %v646_v0 = vpop.f32.mrf.mxu0  ;;  %v674_v1 = vpop.f32.mrf.mxu1 }
 0x10d   :  { %555 = vst [vmem:[%s1031_s4 + $0xb8] sm:$0xff] %v530_v62  ;;  %414 = vst [vmem:[%s1030_s3 + $0x50] sm:$0xff] %v389_v61  ;;  %vm467_vm5 = vcmp.ge.f32.partialorder %v389_v61, 0.0  ;;  %v492_v2 = vmul.f32 0.2, %v389_v61  ;;  %vm481_vm6 = vcmp.ge.f32.partialorder %v403_v63, 0.0 }
 0x10e   :  { %428 = vst [vmem:[%s1030_s3 + $0xc0] sm:$0xff] %v403_v63  ;;  %v506_v3 = vmul.f32 0.2, %v403_v63  ;;  %v320_v4 = vpop.f32.mrf.mxu0  ;;  %v376_v5 = vpop.f32.mrf.mxu1 }
 0x10f   :  { %v517_v6 = vsel %vm467_vm5, %v389_v61, %v492_v2  ;;  %v390_v7 = vadd.f32 %v850_v22, %v320_v4 }
 0x110   :  { %v531_v8 = vsel %vm481_vm6, %v403_v63, %v506_v3  ;;  %542 = vst [vmem:[%s1031_s4 + $0x50] sm:$0xff] %v517_v6  ;;  %v647_v9 = vpop.f32.mrf.mxu0  ;;  %v675_v10 = vpop.f32.mrf.mxu1 }
 0x111   :  { %556 = vst [vmem:[%s1031_s4 + $0xc0] sm:$0xff] %v531_v8  ;;  %415 = vst [vmem:[%s1030_s3 + $0x58] sm:$0xff] %v390_v7  ;;  %vm468_vm7 = vcmp.ge.f32.partialorder %v390_v7, 0.0  ;;  %v493_v11 = vmul.f32 0.2, %v390_v7 }
 0x112   :  { %v325_v12 = vpop.f32.mrf.mxu0 }
 0x113   :  { %v518_v13 = vsel %vm468_vm7, %v390_v7, %v493_v11  ;;  %v391_v14 = vadd.f32 %v850_v22, %v325_v12 }
 0x114   :  { %543 = vst [vmem:[%s1031_s4 + $0x58] sm:$0xff] %v518_v13  ;;  %v650_v15 = vpop.f32.mrf.mxu0 }
 0x115   :  { %416 = vst [vmem:[%s1030_s3 + $0x60] sm:$0xff] %v391_v14  ;;  %vm469_vm8 = vcmp.ge.f32.partialorder %v391_v14, 0.0  ;;  %v494_v16 = vmul.f32 0.2, %v391_v14 }
 0x116   :  { %v328_v17 = vpop.f32.mrf.mxu0 }
 0x117   :  { %v519_v18 = vsel %vm469_vm8, %v391_v14, %v494_v16  ;;  %v392_v19 = vadd.f32 %v850_v22, %v328_v17 }
 0x118   :  { %544 = vst [vmem:[%s1031_s4 + $0x60] sm:$0xff] %v519_v18  ;;  %v651_v20 = vpop.f32.mrf.mxu0 }
 0x119   :  { %417 = vst [vmem:[%s1030_s3 + $0x68] sm:$0xff] %v392_v19  ;;  %vm470_vm9 = vcmp.ge.f32.partialorder %v392_v19, 0.0  ;;  %v495_v21 = vmul.f32 0.2, %v392_v19 }
 0x11b   :  { %v520_v23 = vsel %vm470_vm9, %v392_v19, %v495_v21 }
 0x11c   :  { %545 = vst [vmem:[%s1031_s4 + $0x68] sm:$0xff] %v520_v23 }

// kernel: multiscale_forward.8
= control target key start
LH: loop header
LB: loop body
LE: loop exit
PB: predicated region body
PF: predicated region fallthrough
CT: control target
= control target key end

     0   :  { %s806_s1 = inlined_call_operand.vmem [shape: bf16[256,128], index: 1, kind: input, shape index: {}]   ;;  %s807_s0 = inlined_call_operand.vmem [shape: bf16[144,256], index: 0, kind: input, shape index: {}]   ;;  %s808_s2 = inlined_call_operand.vmem [shape: f32[1,128], index: 2, kind: input, shape index: {}]   ;;  %s809_s3 = inlined_call_operand.vmem [shape: f32[144,128], index: 3, kind: output, shape index: {}]  }
   0x1   :  { %v564_v0 = vld [vmem:[%s806_s1 + $0x78] sm:$0xff]   ;;  %v566_v2 = vld [vmem:[%s806_s1 + $0x70] sm:$0xff]   ;;  %v568_v4 = vld [vmem:[%s806_s1 + $0x68] sm:$0xff]  }
   0x2   :  { %v565_v1 = vld [vmem:[%s806_s1 + $0x38] sm:$0xff]   ;;  %478 = vmatprep.subr.bf16.mxu0 %v564_v0  ;;  %548 = vmatprep.subr.bf16.mxu1 %v564_v0  ;;  %v567_v3 = vld [vmem:[%s806_s1 + $0x30] sm:$0xff]   ;;  %v569_v5 = vld [vmem:[%s806_s1 + $0x28] sm:$0xff]  }
   0x3   :  { %479 = vmatpush3.bf16.msra.mxu0 %v565_v1  ;;  %556 = vmatpush3.bf16.msra.mxu1 %v565_v1  ;;  %v570_v6 = vld [vmem:[%s806_s1 + $0x60] sm:$0xff]   ;;  %v572_v8 = vld [vmem:[%s806_s1 + $0x58] sm:$0xff]   ;;  %v574_v10 = vld [vmem:[%s806_s1 + $0x50] sm:$0xff]  }
   0x4   :  { %480 = vmatprep.subr.bf16.mxu0 %v566_v2  ;;  %549 = vmatprep.subr.bf16.mxu1 %v566_v2  ;;  %v571_v7 = vld [vmem:[%s806_s1 + $0x20] sm:$0xff]   ;;  %v573_v9 = vld [vmem:[%s806_s1 + $0x18] sm:$0xff]   ;;  %v575_v13 = vld [vmem:[%s806_s1 + $0x10] sm:$0xff]  }
   0x5   :  { %v582_v11 = vld [vmem:[%s807_s0 + $0x4] ss:$8 sps:$4 sm:$0xff]   ;;  %v585_v12 = vld [vmem:[%s807_s0 + $0x54] ss:$8 sps:$4 sm:$0xff]   ;;  %v580_v18 = vld [vmem:[%s807_s0] ss:$8 sps:$4 sm:$0xff]  }
   0x6   :  { %v576_v14 = vld [vmem:[%s806_s1 + $0x48] sm:$0xff]   ;;  %330 = vmatprep.mubr.bf16.mxu0 %v582_v11  ;;  %370 = vmatprep.mubr.bf16.mxu1 %v585_v12  ;;  %v578_v16 = vld [vmem:[%s806_s1 + $0x40] sm:$0xff]   ;;  %v583_v19 = vld [vmem:[%s807_s0 + $0x50] ss:$8 sps:$4 sm:$0xff]  }
   0x7   :  { %481 = vmatpush3.bf16.msra.mxu0 %v567_v3  ;;  %557 = vmatpush3.bf16.msra.mxu1 %v567_v3  ;;  %v577_v15 = vld [vmem:[%s806_s1 + $0x8] sm:$0xff]   ;;  %v579_v17 = vld [vmem:[%s806_s1] sm:$0xff]   ;;  %v586_v20 = vld [vmem:[%s807_s0 + $0x14] ss:$8 sps:$4 sm:$0xff]  }
   0x8   :  { %482 = vmatprep.subr.bf16.mxu0 %v568_v4  ;;  %550 = vmatprep.subr.bf16.mxu1 %v568_v4  ;;  %v589_v21 = vld [vmem:[%s807_s0 + $0x64] ss:$8 sps:$4 sm:$0xff]   ;;  %v588_v22 = vld [vmem:[%s807_s0 + $0x10] ss:$8 sps:$4 sm:$0xff]   ;;  %v591_v23 = vld [vmem:[%s807_s0 + $0x60] ss:$8 sps:$4 sm:$0xff]  }
   0x9   :  { %v592_v24 = vld [vmem:[%s807_s0 + $0x24] ss:$8 sps:$4 sm:$0xff]   ;;  %v595_v25 = vld [vmem:[%s807_s0 + $0x74] ss:$8 sps:$4 sm:$0xff]   ;;  %v594_v26 = vld [vmem:[%s807_s0 + $0x20] ss:$8 sps:$4 sm:$0xff]  }
   0xa   :  { %v597_v27 = vld [vmem:[%s807_s0 + $0x70] ss:$8 sps:$4 sm:$0xff]   ;;  %v598_v28 = vld [vmem:[%s807_s0 + $0x34] ss:$8 sps:$4 sm:$0xff]   ;;  %v601_v29 = vld [vmem:[%s807_s0 + $0x84] ss:$8 sps:$4 sm:$0xff]  }
   0xb   :  { %483 = vmatpush3.bf16.msra.mxu0 %v569_v5  ;;  %558 = vmatpush3.bf16.msra.mxu1 %v569_v5  ;;  %v600_v30 = vld [vmem:[%s807_s0 + $0x30] ss:$8 sps:$4 sm:$0xff]   ;;  %v603_v31 = vld [vmem:[%s807_s0 + $0x80] ss:$8 sps:$4 sm:$0xff]   ;;  %v604_v32 = vld [vmem:[%s807_s0 + $0x44] ss:$8 sps:$4 sm:$0xff]  }
   0xc   :  { %484 = vmatprep.subr.bf16.mxu0 %v570_v6  ;;  %551 = vmatprep.subr.bf16.mxu1 %v570_v6  ;;  %v606_v33 = vld [vmem:[%s807_s0 + $0x40] ss:$8 sps:$4 sm:$0xff]  }
   0xd   :  { %v732_v36 = vld [vmem:[%s808_s2] ss:$0 sm:$0xff] }
   0xf   :  { %485 = vmatpush3.bf16.msra.mxu0 %v571_v7  ;;  %559 = vmatpush3.bf16.msra.mxu1 %v571_v7 }
  0x10   :  { %486 = vmatprep.subr.bf16.mxu0 %v572_v8  ;;  %552 = vmatprep.subr.bf16.mxu1 %v572_v8 }
  0x13   :  { %487 = vmatpush3.bf16.msra.mxu0 %v573_v9  ;;  %560 = vmatpush3.bf16.msra.mxu1 %v573_v9 }
  0x14   :  { %488 = vmatprep.subr.bf16.mxu0 %v574_v10  ;;  %553 = vmatprep.subr.bf16.mxu1 %v574_v10 }
  0x17   :  { %489 = vmatpush3.bf16.msra.mxu0 %v575_v13  ;;  %561 = vmatpush3.bf16.msra.mxu1 %v575_v13 }
  0x18   :  { %490 = vmatprep.subr.bf16.mxu0 %v576_v14  ;;  %554 = vmatprep.subr.bf16.mxu1 %v576_v14 }
  0x1b   :  { %491 = vmatpush3.bf16.msra.mxu0 %v577_v15  ;;  %562 = vmatpush3.bf16.msra.mxu1 %v577_v15 }
  0x1c   :  { %492 = vmatprep.subr.bf16.mxu0 %v578_v16  ;;  %555 = vmatprep.subr.bf16.mxu1 %v578_v16 }
  0x1f   :  { %493 = vmatpush3.bf16.msra.mxu0 %v579_v17  ;;  %563 = vmatpush3.bf16.msra.mxu1 %v579_v17 }
  0x22   :  { %331 = vmatmul.mubr.bf16.vlgmr.msra.gmra.mxu0 %v580_v18  ;;  %371 = vmatmul.mubr.bf16.vlgmr.msra.gmra.mxu1 %v583_v19 }
  0x23   :  { %338 = vmatprep.mubr.bf16.mxu0 %v586_v20  ;;  %378 = vmatprep.mubr.bf16.mxu1 %v589_v21 }
  0x2a   :  { %339 = vmatmul.mubr.bf16.gmra.mxu0 %v588_v22  ;;  %379 = vmatmul.mubr.bf16.gmra.mxu1 %v591_v23 }
  0x2b   :  { %346 = vmatprep.mubr.bf16.mxu0 %v592_v24  ;;  %386 = vmatprep.mubr.bf16.mxu1 %v595_v25 }
  0x32   :  { %347 = vmatmul.mubr.bf16.gmra.mxu0 %v594_v26  ;;  %387 = vmatmul.mubr.bf16.gmra.mxu1 %v597_v27 }
  0x33   :  { %354 = vmatprep.mubr.bf16.mxu0 %v598_v28  ;;  %394 = vmatprep.mubr.bf16.mxu1 %v601_v29 }
  0x3a   :  { %355 = vmatmul.mubr.bf16.gmra.mxu0 %v600_v30  ;;  %395 = vmatmul.mubr.bf16.gmra.mxu1 %v603_v31 }
  0x3b   :  { %362 = vmatprep.mubr.bf16.mxu0 %v604_v32 }
  0x42   :  { %363 = vmatmul.mubr.bf16.gmra.mxu0 %v606_v33 }
  0xe2   :  { %v494_v34 = vpop.f32.mrf.mxu0  ;;  %v524_v35 = vpop.f32.mrf.mxu1 }
  0xe4   :  { %v495_v37 = vpop.f32.mrf.mxu0  ;;  %v525_v38 = vpop.f32.mrf.mxu1 }
  0xe5   :  { %v496_v39 = vadd.f32 %v495_v37, %v494_v34  ;;  %v526_v40 = vadd.f32 %v525_v38, %v524_v35 }
  0xe6   :  { %v497_v41 = vpop.f32.mrf.mxu0  ;;  %v527_v42 = vpop.f32.mrf.mxu1 }
  0xe7   :  { %v403_v43 = vadd.f32 %v496_v39, %v732_v36  ;;  %v413_v44 = vadd.f32 %v526_v40, %v732_v36 }
  0xe8   :  { %v498_v45 = vpop.f32.mrf.mxu0  ;;  %v528_v46 = vpop.f32.mrf.mxu1 }
  0xe9   :  { %421 = vst [vmem:[%s809_s3] sm:$0xff] %v403_v43  ;;  %431 = vst [vmem:[%s809_s3 + $0x50] sm:$0xff] %v413_v44  ;;  %v499_v47 = vadd.f32 %v498_v45, %v497_v41  ;;  %v529_v48 = vadd.f32 %v528_v46, %v527_v42 }
  0xea   :  { %v500_v49 = vpop.f32.mrf.mxu0  ;;  %v530_v50 = vpop.f32.mrf.mxu1 }
  0xeb   :  { %v404_v51 = vadd.f32 %v499_v47, %v732_v36  ;;  %v414_v52 = vadd.f32 %v529_v48, %v732_v36 }
  0xec   :  { %v501_v53 = vpop.f32.mrf.mxu0  ;;  %v531_v54 = vpop.f32.mrf.mxu1 }
  0xed   :  { %422 = vst [vmem:[%s809_s3 + $0x8] sm:$0xff] %v404_v51  ;;  %432 = vst [vmem:[%s809_s3 + $0x58] sm:$0xff] %v414_v52  ;;  %v502_v55 = vadd.f32 %v501_v53, %v500_v49  ;;  %v532_v56 = vadd.f32 %v531_v54, %v530_v50 }
  0xee   :  { %v503_v57 = vpop.f32.mrf.mxu0  ;;  %v533_v58 = vpop.f32.mrf.mxu1 }
  0xef   :  { %v405_v59 = vadd.f32 %v502_v55, %v732_v36  ;;  %v415_v60 = vadd.f32 %v532_v56, %v732_v36 }
  0xf0   :  { %v504_v61 = vpop.f32.mrf.mxu0  ;;  %v534_v62 = vpop.f32.mrf.mxu1 }
  0xf1   :  { %423 = vst [vmem:[%s809_s3 + $0x10] sm:$0xff] %v405_v59  ;;  %433 = vst [vmem:[%s809_s3 + $0x60] sm:$0xff] %v415_v60  ;;  %v505_v63 = vadd.f32 %v504_v61, %v503_v57  ;;  %v535_v0 = vadd.f32 %v534_v62, %v533_v58 }
  0xf2   :  { %v506_v1 = vpop.f32.mrf.mxu0  ;;  %v536_v2 = vpop.f32.mrf.mxu1 }
  0xf3   :  { %v406_v3 = vadd.f32 %v505_v63, %v732_v36  ;;  %v416_v4 = vadd.f32 %v535_v0, %v732_v36 }
  0xf4   :  { %v507_v5 = vpop.f32.mrf.mxu0  ;;  %v537_v6 = vpop.f32.mrf.mxu1 }
  0xf5   :  { %424 = vst [vmem:[%s809_s3 + $0x18] sm:$0xff] %v406_v3  ;;  %434 = vst [vmem:[%s809_s3 + $0x68] sm:$0xff] %v416_v4  ;;  %v508_v7 = vadd.f32 %v507_v5, %v506_v1  ;;  %v538_v8 = vadd.f32 %v537_v6, %v536_v2 }
  0xf6   :  { %v509_v9 = vpop.f32.mrf.mxu0  ;;  %v539_v10 = vpop.f32.mrf.mxu1 }
  0xf7   :  { %v407_v11 = vadd.f32 %v508_v7, %v732_v36  ;;  %v417_v12 = vadd.f32 %v538_v8, %v732_v36 }
  0xf8   :  { %v510_v13 = vpop.f32.mrf.mxu0  ;;  %v540_v14 = vpop.f32.mrf.mxu1 }
  0xf9   :  { %425 = vst [vmem:[%s809_s3 + $0x20] sm:$0xff] %v407_v11  ;;  %435 = vst [vmem:[%s809_s3 + $0x70] sm:$0xff] %v417_v12  ;;  %v511_v15 = vadd.f32 %v510_v13, %v509_v9  ;;  %v541_v16 = vadd.f32 %v540_v14, %v539_v10 }
  0xfa   :  { %v512_v17 = vpop.f32.mrf.mxu0  ;;  %v542_v18 = vpop.f32.mrf.mxu1 }
  0xfb   :  { %v408_v19 = vadd.f32 %v511_v15, %v732_v36  ;;  %v418_v20 = vadd.f32 %v541_v16, %v732_v36 }
  0xfc   :  { %v513_v21 = vpop.f32.mrf.mxu0  ;;  %v543_v22 = vpop.f32.mrf.mxu1 }
  0xfd   :  { %426 = vst [vmem:[%s809_s3 + $0x28] sm:$0xff] %v408_v19  ;;  %436 = vst [vmem:[%s809_s3 + $0x78] sm:$0xff] %v418_v20  ;;  %v514_v23 = vadd.f32 %v513_v21, %v512_v17  ;;  %v544_v24 = vadd.f32 %v543_v22, %v542_v18 }
  0xfe   :  { %v515_v25 = vpop.f32.mrf.mxu0  ;;  %v545_v26 = vpop.f32.mrf.mxu1 }
  0xff   :  { %v409_v27 = vadd.f32 %v514_v23, %v732_v36  ;;  %v419_v28 = vadd.f32 %v544_v24, %v732_v36 }
 0x100   :  { %v516_v29 = vpop.f32.mrf.mxu0  ;;  %v546_v30 = vpop.f32.mrf.mxu1 }
 0x101   :  { %427 = vst [vmem:[%s809_s3 + $0x30] sm:$0xff] %v409_v27  ;;  %437 = vst [vmem:[%s809_s3 + $0x80] sm:$0xff] %v419_v28  ;;  %v517_v31 = vadd.f32 %v516_v29, %v515_v25  ;;  %v547_v32 = vadd.f32 %v546_v30, %v545_v26 }
 0x102   :  { %v518_v33 = vpop.f32.mrf.mxu0 }
 0x103   :  { %v410_v34 = vadd.f32 %v517_v31, %v732_v36  ;;  %v420_v35 = vadd.f32 %v547_v32, %v732_v36 }
 0x104   :  { %v519_v37 = vpop.f32.mrf.mxu0 }
 0x105   :  { %428 = vst [vmem:[%s809_s3 + $0x38] sm:$0xff] %v410_v34  ;;  %438 = vst [vmem:[%s809_s3 + $0x88] sm:$0xff] %v420_v35  ;;  %v520_v38 = vadd.f32 %v519_v37, %v518_v33 }
 0x106   :  { %v521_v39 = vpop.f32.mrf.mxu0 }
 0x107   :  { %v411_v40 = vadd.f32 %v520_v38, %v732_v36 }
 0x108   :  { %v522_v41 = vpop.f32.mrf.mxu0 }
 0x109   :  { %429 = vst [vmem:[%s809_s3 + $0x40] sm:$0xff] %v411_v40  ;;  %v523_v42 = vadd.f32 %v522_v41, %v521_v39 }
 0x10b   :  { %v412_v43 = vadd.f32 %v523_v42, %v732_v36 }
 0x10d   :  { %430 = vst [vmem:[%s809_s3 + $0x48] sm:$0xff] %v412_v43 }

// kernel: multiscale_forward.9
= control target key start
LH: loop header
LB: loop body
LE: loop exit
PB: predicated region body
PF: predicated region fallthrough
CT: control target
= control target key end

     0   :  { %s488_s0 = inlined_call_operand.vmem [shape: bf16[64,128], index: 0, kind: input, shape index: {}]   ;;  %s489_s1 = inlined_call_operand.vmem [shape: bf16[128,128], index: 1, kind: input, shape index: {}]   ;;  %s490_s2 = inlined_call_operand.vmem [shape: f32[1,128], index: 2, kind: input, shape index: {}]   ;;  %s491_s3 = inlined_call_operand.hbm [shape: f32[64,128], index: 3, kind: output, shape index: {0}]   ;;  %s492_s4 = inlined_call_operand.vmem [shape: f32[64,128], index: 4, kind: output, shape index: {1}]  }
   0x1   :  { %v353_v0 = vld [vmem:[%s489_s1 + $0x38] sm:$0xff]   ;;  %v354_v1 = vld [vmem:[%s489_s1 + $0x30] sm:$0xff]   ;;  %v355_v2 = vld [vmem:[%s489_s1 + $0x28] sm:$0xff]  }
   0x2   :  { %310 = vmatprep.subr.bf16.mxu0 %v353_v0  ;;  %334 = vmatprep.subr.bf16.mxu1 %v353_v0  ;;  %v356_v3 = vld [vmem:[%s489_s1 + $0x20] sm:$0xff]   ;;  %v362_v5 = vld [vmem:[%s488_s0 + $0x10] sm:$0xff]   ;;  %v357_v6 = vld [vmem:[%s489_s1 + $0x18] sm:$0xff]  }
   0x3   :  { %311 = vmatpush3.bf16.msra.mxu0 %v353_v0  ;;  %342 = vmatpush3.bf16.msra.mxu1 %v353_v0  ;;  %v361_v4 = vld [vmem:[%s488_s0] sm:$0xff]  }
   0x4   :  { %312 = vmatprep.subr.bf16.mxu0 %v354_v1  ;;  %335 = vmatprep.subr.bf16.mxu1 %v354_v1 }
   0x5   :  { %326 = vmatprep.mubr.bf16.mxu0 %v361_v4 }
   0x7   :  { %313 = vmatpush3.bf16.msra.mxu0 %v354_v1  ;;  %343 = vmatpush3.bf16.msra.mxu1 %v354_v1 }
   0x8   :  { %314 = vmatprep.subr.bf16.mxu0 %v355_v2  ;;  %336 = vmatprep.subr.bf16.mxu1 %v355_v2 }
   0xb   :  { %315 = vmatpush3.bf16.msra.mxu0 %v355_v2  ;;  %344 = vmatpush3.bf16.msra.mxu1 %v355_v2 }
   0xc   :  { %316 = vmatprep.subr.bf16.mxu0 %v356_v3  ;;  %337 = vmatprep.subr.bf16.mxu1 %v356_v3 }
   0xd   :  { %10 = vsyncpa [#allocation3], 0  ;;  %330 = vmatprep.mubr.bf16.mxu1 %v362_v5  ;;  %v358_v7 = vld [vmem:[%s489_s1 + $0x10] sm:$0xff]   ;;  %v359_v8 = vld [vmem:[%s489_s1 + $0x8] sm:$0xff]  }
   0xe   :  { %v360_v9 = vld [vmem:[%s489_s1] sm:$0xff]   ;;  %v363_v10 = vld [vmem:[%s488_s0 + $0x8] sm:$0xff]   ;;  %v364_v11 = vld [vmem:[%s488_s0 + $0x18] sm:$0xff]   ;;  %s387_s0 = smov [#allocation2]  }
   0xf   :  { %317 = vmatpush3.bf16.msra.mxu0 %v356_v3  ;;  %345 = vmatpush3.bf16.msra.mxu1 %v356_v3  ;;  %v285_v12 = vld [vmem:[%s490_s2] ss:$0 sm:$0xff]  ;;  %s270_s1 = sshll.u32 %s387_s0, 4  ;;  %s460_s1 = int_to_ptr.vmem [resolvable:$true] %s270_s1 }
  0x10   :  { %318 = vmatprep.subr.bf16.mxu0 %v357_v6  ;;  %338 = vmatprep.subr.bf16.mxu1 %v357_v6  ;;  %s365_s26 = scalar_lea.vmem %s460_s1, 1024  ;;  %p370_p1 = scmp.lt.s32.totalorder %s460_s1, %s460_s1 }
  0x11   :  { %p366_p0 = scmp.ne.s32.totalorder %s460_s1, %s365_s26  ;;  %p371_p2 = scmp.lt.s32.totalorder %s365_s26, %s365_s26 }
  0x13   :  { %319 = vmatpush3.bf16.msra.mxu0 %v357_v6  ;;  %346 = vmatpush3.bf16.msra.mxu1 %v357_v6  ;;  %p372_p3 = por %p371_p2, %p370_p1 }
  0x14   :  { %320 = vmatprep.subr.bf16.mxu0 %v358_v7  ;;  %339 = vmatprep.subr.bf16.mxu1 %v358_v7 }
  0x15   :  { %p373_p4 = pnand %p372_p3, %p366_p0 }
  0x17   :  { %321 = vmatpush3.bf16.msra.mxu0 %v358_v7  ;;  %347 = vmatpush3.bf16.msra.mxu1 %v358_v7 }
  0x18   :  { %322 = vmatprep.subr.bf16.mxu0 %v359_v8  ;;  %340 = vmatprep.subr.bf16.mxu1 %v359_v8 }
  0x1b   :  { %323 = vmatpush3.bf16.msra.mxu0 %v359_v8  ;;  %348 = vmatpush3.bf16.msra.mxu1 %v359_v8 }
  0x1c   :  { %324 = vmatprep.subr.bf16.mxu0 %v360_v9  ;;  %341 = vmatprep.subr.bf16.mxu1 %v360_v9 }
  0x1f   :  { %325 = vmatpush3.bf16.msra.mxu0 %v360_v9  ;;  %349 = vmatpush3.bf16.msra.mxu1 %v360_v9 }
  0x22   :  { %327 = vmatmul.mubr.bf16.vlgmr.msra.gmra.mxu0 %v363_v10  ;;  %331 = vmatmul.mubr.bf16.vlgmr.msra.gmra.mxu1 %v364_v11 }
  0xe2   :  { %v328_v13 = vpop.f32.mrf.mxu0  ;;  %v332_v14 = vpop.f32.mrf.mxu1 }
  0xe3   :  { %v208_v15 = vadd.f32 %v328_v13, %v285_v12  ;;  %v212_v16 = vadd.f32 %v332_v14, %v285_v12 }
  0xe4   :  { %v175_v17 = vpop.f32.mrf.mxu0  ;;  %v191_v18 = vpop.f32.mrf.mxu1 }
  0xe5   :  { %216 = vst [vmem:[#allocation2 + $0x10] sm:$0xff] %v208_v15  ;;  %vm235_vm0 = vcmp.ge.f32.partialorder %v208_v15, 0.0  ;;  %v243_v19 = vmul.f32 0.2, %v208_v15  ;;  %220 = vst [vmem:[#allocation2 + $0x30] sm:$0xff] %v212_v16  ;;  %vm239_vm1 = vcmp.ge.f32.partialorder %v212_v16, 0.0  ;;  %v206_v21 = vadd.f32 %v285_v12, %v175_v17 }
  0xe6   :  { %v247_v20 = vmul.f32 0.2, %v212_v16  ;;  %v210_v22 = vadd.f32 %v285_v12, %v191_v18  ;;  %v329_v23 = vpop.f32.mrf.mxu0  ;;  %v333_v24 = vpop.f32.mrf.mxu1 }
  0xe7   :  { %v251_v25 = vsel %vm235_vm0, %v208_v15, %v243_v19  ;;  %v209_v27 = vadd.f32 %v329_v23, %v285_v12  ;;  %v213_v28 = vadd.f32 %v333_v24, %v285_v12  ;;  %214 = vst [vmem:[#allocation2] sm:$0xff] %v206_v21  ;;  %vm233_vm2 = vcmp.ge.f32.partialorder %v206_v21, 0.0 }
  0xe8   :  { %v255_v26 = vsel %vm239_vm1, %v212_v16, %v247_v20  ;;  %259 = vst [vmem:[%s492_s4 + $0x10] sm:$0xff] %v251_v25  ;;  %v241_v29 = vmul.f32 0.2, %v206_v21  ;;  %218 = vst [vmem:[#allocation2 + $0x20] sm:$0xff] %v210_v22  ;;  %vm237_vm3 = vcmp.ge.f32.partialorder %v210_v22, 0.0  ;;  %v178_v31 = vpop.f32.mrf.mxu0  ;;  %v194_v32 = vpop.f32.mrf.mxu1 }
  0xe9   :  { %263 = vst [vmem:[%s492_s4 + $0x30] sm:$0xff] %v255_v26  ;;  %v245_v30 = vmul.f32 0.2, %v210_v22  ;;  %217 = vst [vmem:[#allocation2 + $0x18] sm:$0xff] %v209_v27  ;;  %vm236_vm4 = vcmp.ge.f32.partialorder %v209_v27, 0.0  ;;  %vm240_vm5 = vcmp.ge.f32.partialorder %v213_v28, 0.0  ;;  %v207_v37 = vadd.f32 %v285_v12, %v178_v31 }
  0xea   :  { %v244_v33 = vmul.f32 0.2, %v209_v27  ;;  %221 = vst [vmem:[#allocation2 + $0x38] sm:$0xff] %v213_v28  ;;  %v248_v34 = vmul.f32 0.2, %v213_v28  ;;  %v249_v35 = vsel %vm233_vm2, %v206_v21, %v241_v29  ;;  %v211_v38 = vadd.f32 %v285_v12, %v194_v32 }
  0xeb   :  { %v253_v36 = vsel %vm237_vm3, %v210_v22, %v245_v30  ;;  %257 = vst [vmem:[%s492_s4] sm:$0xff] %v249_v35  ;;  %215 = vst [vmem:[#allocation2 + $0x8] sm:$0xff] %v207_v37  ;;  %vm234_vm6 = vcmp.ge.f32.partialorder %v207_v37, 0.0  ;;  %v242_v41 = vmul.f32 0.2, %v207_v37 }
  0xec   :  { %261 = vst [vmem:[%s492_s4 + $0x20] sm:$0xff] %v253_v36  ;;  %v252_v39 = vsel %vm236_vm4, %v209_v27, %v244_v33  ;;  %v256_v40 = vsel %vm240_vm5, %v213_v28, %v248_v34  ;;  %219 = vst [vmem:[#allocation2 + $0x28] sm:$0xff] %v211_v38  ;;  %vm238_vm7 = vcmp.ge.f32.partialorder %v211_v38, 0.0  ;;  %v246_v42 = vmul.f32 0.2, %v211_v38 }
  0xed   :  { %260 = vst [vmem:[%s492_s4 + $0x18] sm:$0xff] %v252_v39  ;;  %264 = vst [vmem:[%s492_s4 + $0x38] sm:$0xff] %v256_v40 }
  0xee   :  { %376 = shalt.err (!%p373_p4)
}
  0xef   :  { %s388_s27 = smov 128   ;;  %s389_s28 = smov 8   ;;  %v250_v43 = vsel %vm234_vm6, %v207_v37, %v242_v41  ;;  %v254_v44 = vsel %vm238_vm7, %v211_v38, %v246_v42 }
  0xf0   :  { %276 = dma.vmem_to_hbm [thread:$0]  %s460_s1, 1024, %s491_s3, [#allocation3], %s388_s27, %s388_s27, %s389_s28  }
  0xf1   :  { %258 = vst [vmem:[%s492_s4 + $0x8] sm:$0xff] %v250_v43  ;;  %262 = vst [vmem:[%s492_s4 + $0x28] sm:$0xff] %v254_v44 }
  0xf2   :  { %385 = dma.done.wait [#allocation3], 1024  }
  0xf3   :  { %386 = vsyncadd [#allocation3], 4294966272 }
  0xf4   :  { %284 = vsyncpa [#allocation3], 1 }

// kernel: multiscale_forward.10
= control target key start
LH: loop header
LB: loop body
LE: loop exit
PB: predicated region body
PF: predicated region fallthrough
CT: control target
= control target key end

     0   :  { %v305_v0 = vmov 0.0   ;;  %vm306_vm0 = vmmov 0   ;;  %s401_s1 = inlined_call_operand.vmem [shape: bf16[128,128], index: 1, kind: input, shape index: {}]   ;;  %s402_s0 = inlined_call_operand.vmem [shape: bf16[40,128], index: 0, kind: input, shape index: {}]   ;;  %s403_s2 = inlined_call_operand.vmem [shape: f32[1,128], index: 2, kind: input, shape index: {}]   ;;  %s404_s3 = inlined_call_operand.vmem [shape: f32[40,128], index: 3, kind: output, shape index: {0}]   ;;  %s405_s4 = inlined_call_operand.vmem [shape: f32[40,128], index: 4, kind: output, shape index: {1}]  }
   0x1   :  { %248 = vmatprep.subr.bf16.mxu0 %v305_v0  ;;  %276 = vmatprep.subr.bf16.mxu1 %v305_v0  ;;  %v294_v1 = vld [vmem:[%s401_s1 + $0x38] sm:$0xff]   ;;  %v295_v2 = vld [vmem:[%s401_s1 + $0x30] sm:$0xff]   ;;  %v296_v3 = vld [vmem:[%s401_s1 + $0x28] sm:$0xff]  }
   0x2   :  { %264 = vmatprep.mubr.msk.bf16.mxu0 %vm306_vm0, %v305_v0  ;;  %268 = vmatprep.mubr.msk.bf16.mxu1 %vm306_vm0, %v305_v0  ;;  %v297_v4 = vld [vmem:[%s401_s1 + $0x20] sm:$0xff]   ;;  %v298_v5 = vld [vmem:[%s401_s1 + $0x18] sm:$0xff]   ;;  %v299_v6 = vld [vmem:[%s401_s1 + $0x10] sm:$0xff]  }
   0x3   :  { %249 = vmatpush3.bf16.msra.mxu0 %v294_v1  ;;  %284 = vmatpush3.bf16.msra.mxu1 %v294_v1  ;;  %v300_v7 = vld [vmem:[%s401_s1 + $0x8] sm:$0xff]   ;;  %v301_v8 = vld [vmem:[%s401_s1] sm:$0xff]   ;;  %v304_v11 = vld [vmem:[%s402_s0 + $0x10] ss:$0 sps:$4 sm:$0xff]  }
   0x4   :  { %250 = vmatprep.subr.bf16.mxu0 %v305_v0  ;;  %277 = vmatprep.subr.bf16.mxu1 %v305_v0  ;;  %v302_v9 = vld [vmem:[%s402_s0] sm:$0xff]   ;;  %v303_v10 = vld [vmem:[%s402_s0 + $0x8] sm:$0xff]  }
   0x5   :  { %v225_v12 = vld [vmem:[%s403_s2] ss:$0 sm:$0xff] }
   0x7   :  { %251 = vmatpush3.bf16.msra.mxu0 %v295_v2  ;;  %285 = vmatpush3.bf16.msra.mxu1 %v295_v2 }
   0x8   :  { %252 = vmatprep.subr.bf16.mxu0 %v305_v0  ;;  %278 = vmatprep.subr.bf16.mxu1 %v305_v0 }
   0xb   :  { %253 = vmatpush3.bf16.msra.mxu0 %v296_v3  ;;  %286 = vmatpush3.bf16.msra.mxu1 %v296_v3 }
   0xc   :  { %254 = vmatprep.subr.bf16.mxu0 %v305_v0  ;;  %279 = vmatprep.subr.bf16.mxu1 %v305_v0 }
   0xf   :  { %255 = vmatpush3.bf16.msra.mxu0 %v297_v4  ;;  %287 = vmatpush3.bf16.msra.mxu1 %v297_v4 }
  0x10   :  { %256 = vmatprep.subr.bf16.mxu0 %v305_v0  ;;  %280 = vmatprep.subr.bf16.mxu1 %v305_v0 }
  0x13   :  { %257 = vmatpush3.bf16.msra.mxu0 %v298_v5  ;;  %288 = vmatpush3.bf16.msra.mxu1 %v298_v5 }
  0x14   :  { %258 = vmatprep.subr.bf16.mxu0 %v305_v0  ;;  %281 = vmatprep.subr.bf16.mxu1 %v305_v0 }
  0x17   :  { %259 = vmatpush3.bf16.msra.mxu0 %v299_v6  ;;  %289 = vmatpush3.bf16.msra.mxu1 %v299_v6 }
  0x18   :  { %260 = vmatprep.subr.bf16.mxu0 %v305_v0  ;;  %282 = vmatprep.subr.bf16.mxu1 %v305_v0 }
  0x1b   :  { %261 = vmatpush3.bf16.msra.mxu0 %v300_v7  ;;  %290 = vmatpush3.bf16.msra.mxu1 %v300_v7 }
  0x1c   :  { %262 = vmatprep.subr.bf16.mxu0 %v305_v0  ;;  %283 = vmatprep.subr.bf16.mxu1 %v305_v0 }
  0x1f   :  { %263 = vmatpush3.bf16.msra.mxu0 %v301_v8  ;;  %291 = vmatpush3.bf16.msra.mxu1 %v301_v8 }
  0x22   :  { %265 = vmatmul.mubr.bf16.vlgmr.msra.gmra.mxu0 %v302_v9  ;;  %269 = vmatmul.mubr.bf16.vlgmr.msra.gmra.mxu1 %v303_v10 }
  0x23   :  { %272 = vmatprep.mubr.msk.bf16.mxu1 %vm306_vm0, %v305_v0 }
  0x2a   :  { %273 = vmatmul.mubr.bf16.gmra.mxu1 %v304_v11 }
  0xe2   :  { %v157_v13 = vpop.f32.mrf.mxu0  ;;  %v165_v14 = vpop.f32.mrf.mxu1 }
  0xe3   :  { %v179_v15 = vadd.f32 %v225_v12, %v157_v13  ;;  %v181_v16 = vadd.f32 %v225_v12, %v165_v14 }
  0xe4   :  { %v266_v17 = vpop.f32.mrf.mxu0  ;;  %v270_v18 = vpop.f32.mrf.mxu1 }
  0xe5   :  { %184 = vst [vmem:[%s404_s3] sm:$0xff] %v179_v15  ;;  %vm197_vm1 = vcmp.ge.f32.partialorder %v179_v15, 0.0  ;;  %v202_v19 = vmul.f32 0.2, %v179_v15  ;;  %186 = vst [vmem:[%s404_s3 + $0x10] sm:$0xff] %v181_v16  ;;  %vm199_vm2 = vcmp.ge.f32.partialorder %v181_v16, 0.0 }
  0xe6   :  { %v204_v20 = vmul.f32 0.2, %v181_v16  ;;  %v160_v21 = vpop.f32.mrf.mxu0  ;;  %v168_v22 = vpop.f32.mrf.mxu1 }
  0xe7   :  { %v207_v23 = vsel %vm197_vm1, %v179_v15, %v202_v19  ;;  %v180_v25 = vadd.f32 %v225_v12, %v160_v21  ;;  %v182_v26 = vadd.f32 %v225_v12, %v168_v22 }
  0xe8   :  { %v209_v24 = vsel %vm199_vm2, %v181_v16, %v204_v20  ;;  %212 = vst [vmem:[%s405_s4] sm:$0xff] %v207_v23  ;;  %v267_v27 = vpop.f32.mrf.mxu0  ;;  %v271_v28 = vpop.f32.mrf.mxu1 }
  0xe9   :  { %214 = vst [vmem:[%s405_s4 + $0x10] sm:$0xff] %v209_v24  ;;  %185 = vst [vmem:[%s404_s3 + $0x8] sm:$0xff] %v180_v25  ;;  %vm198_vm3 = vcmp.ge.f32.partialorder %v180_v25, 0.0  ;;  %v203_v29 = vmul.f32 0.2, %v180_v25  ;;  %vm200_vm4 = vcmp.ge.f32.partialorder %v182_v26, 0.0 }
  0xea   :  { %187 = vst [vmem:[%s404_s3 + $0x18] sm:$0xff] %v182_v26  ;;  %v205_v30 = vmul.f32 0.2, %v182_v26  ;;  %v173_v31 = vpop.f32.mrf.mxu1 }
  0xeb   :  { %v208_v32 = vsel %vm198_vm3, %v180_v25, %v203_v29  ;;  %v183_v34 = vadd.f32 %v225_v12, %v173_v31 }
  0xec   :  { %v210_v33 = vsel %vm200_vm4, %v182_v26, %v205_v30  ;;  %213 = vst [vmem:[%s405_s4 + $0x8] sm:$0xff] %v208_v32  ;;  %v274_v35 = vpop.f32.mrf.mxu1 }
  0xed   :  { %215 = vst [vmem:[%s405_s4 + $0x18] sm:$0xff] %v210_v33  ;;  %188 = vst [vmem:[%s404_s3 + $0x20] sm:$0xff] %v183_v34  ;;  %vm201_vm5 = vcmp.ge.f32.partialorder %v183_v34, 0.0  ;;  %v206_v36 = vmul.f32 0.2, %v183_v34 }
  0xee   :  { %v176_v37 = vpop.f32.mrf.mxu1 }
  0xef   :  { %v211_v38 = vsel %vm201_vm5, %v183_v34, %v206_v36 }
  0xf0   :  { %216 = vst [vmem:[%s405_s4 + $0x20] sm:$0xff] %v211_v38  ;;  %v275_v39 = vpop.f32.mrf.mxu1 }

// kernel: multiscale_forward.11
= control target key start
LH: loop header
LB: loop body
LE: loop exit
PB: predicated region body
PF: predicated region fallthrough
CT: control target
= control target key end

     0   :  { %s362_s1 = inlined_call_operand.vmem [shape: bf16[256,128], index: 1, kind: input, shape index: {}]   ;;  %s363_s0 = inlined_call_operand.vmem [shape: bf16[16,256], index: 0, kind: input, shape index: {}]   ;;  %s364_s2 = inlined_call_operand.vmem [shape: f32[1,128], index: 2, kind: input, shape index: {}]   ;;  %s365_s3 = inlined_call_operand.vmem [shape: f32[16,128], index: 3, kind: output, shape index: {}]  }
   0x1   :  { %v260_v0 = vld [vmem:[%s362_s1 + $0x78] sm:$0xff]   ;;  %v262_v2 = vld [vmem:[%s362_s1 + $0x70] sm:$0xff]   ;;  %v264_v4 = vld [vmem:[%s362_s1 + $0x68] sm:$0xff]  }
   0x2   :  { %v261_v1 = vld [vmem:[%s362_s1 + $0x38] sm:$0xff]   ;;  %238 = vmatprep.subr.bf16.mxu0 %v260_v0  ;;  %v263_v3 = vld [vmem:[%s362_s1 + $0x30] sm:$0xff]   ;;  %v265_v5 = vld [vmem:[%s362_s1 + $0x28] sm:$0xff]  }
   0x3   :  { %239 = vmatpush3.bf16.msra.mxu0 %v261_v1  ;;  %v266_v6 = vld [vmem:[%s362_s1 + $0x60] sm:$0xff]   ;;  %v268_v8 = vld [vmem:[%s362_s1 + $0x58] sm:$0xff]   ;;  %v270_v10 = vld [vmem:[%s362_s1 + $0x50] sm:$0xff]  }
   0x4   :  { %240 = vmatprep.subr.bf16.mxu0 %v262_v2  ;;  %v267_v7 = vld [vmem:[%s362_s1 + $0x20] sm:$0xff]   ;;  %v269_v9 = vld [vmem:[%s362_s1 + $0x18] sm:$0xff]   ;;  %v271_v12 = vld [vmem:[%s362_s1 + $0x10] sm:$0xff]  }
   0x5   :  { %v278_v11 = vld [vmem:[%s363_s0 + $0x4] ss:$8 sps:$4 sm:$0xff]   ;;  %v276_v17 = vld [vmem:[%s363_s0] ss:$8 sps:$4 sm:$0xff]  }
   0x6   :  { %202 = vmatprep.mubr.bf16.mxu0 %v278_v11  ;;  %v272_v13 = vld [vmem:[%s362_s1 + $0x48] sm:$0xff]   ;;  %v274_v15 = vld [vmem:[%s362_s1 + $0x40] sm:$0xff]  }
   0x7   :  { %241 = vmatpush3.bf16.msra.mxu0 %v263_v3  ;;  %v273_v14 = vld [vmem:[%s362_s1 + $0x8] sm:$0xff]   ;;  %v275_v16 = vld [vmem:[%s362_s1] sm:$0xff]  }
   0x8   :  { %242 = vmatprep.subr.bf16.mxu0 %v264_v4  ;;  %v219_v19 = vld [vmem:[%s364_s2] ss:$0 sm:$0xff] }
   0xb   :  { %243 = vmatpush3.bf16.msra.mxu0 %v265_v5 }
   0xc   :  { %244 = vmatprep.subr.bf16.mxu0 %v266_v6 }
   0xf   :  { %245 = vmatpush3.bf16.msra.mxu0 %v267_v7 }
  0x10   :  { %246 = vmatprep.subr.bf16.mxu0 %v268_v8 }
  0x13   :  { %247 = vmatpush3.bf16.msra.mxu0 %v269_v9 }
  0x14   :  { %248 = vmatprep.subr.bf16.mxu0 %v270_v10 }
  0x17   :  { %249 = vmatpush3.bf16.msra.mxu0 %v271_v12 }
  0x18   :  { %250 = vmatprep.subr.bf16.mxu0 %v272_v13 }
  0x1b   :  { %251 = vmatpush3.bf16.msra.mxu0 %v273_v14 }
  0x1c   :  { %252 = vmatprep.subr.bf16.mxu0 %v274_v15 }
  0x1f   :  { %253 = vmatpush3.bf16.msra.mxu0 %v275_v16 }
  0x22   :  { %203 = vmatmul.mubr.bf16.vlgmr.msra.gmra.mxu0 %v276_v17 }
  0xe2   :  { %v254_v18 = vpop.f32.mrf.mxu0 }
  0xe4   :  { %v255_v20 = vpop.f32.mrf.mxu0 }
  0xe5   :  { %v256_v21 = vadd.f32 %v255_v20, %v254_v18 }
  0xe6   :  { %v257_v22 = vpop.f32.mrf.mxu0 }
  0xe7   :  { %v211_v23 = vadd.f32 %v256_v21, %v219_v19 }
  0xe8   :  { %v258_v24 = vpop.f32.mrf.mxu0 }
  0xe9   :  { %213 = vst [vmem:[%s365_s3] sm:$0xff] %v211_v23  ;;  %v259_v25 = vadd.f32 %v258_v24, %v257_v22 }
  0xeb   :  { %v212_v26 = vadd.f32 %v259_v25, %v219_v19 }
  0xed   :  { %214 = vst [vmem:[%s365_s3 + $0x8] sm:$0xff] %v212_v26 }

</bundles_post_ra>
